<compile_context>
chip_gen: v7x
topology: tpu7x:2x2x1
jax: 0.10.0
libtpu: 0.0.40
codegen_flags: <defaults>
</compile_context>

<pallas_src>
import functools

import numpy as np
import jax
import jax.numpy as jnp
from jax.experimental import pallas as pl
from jax.experimental.pallas import tpu as pltpu

BN_EPS = 1e-5


def _fold_bn(gamma, beta, mean, var, eps=BN_EPS):
    scale = gamma / jnp.sqrt(var + eps)
    bias = beta - mean * scale
    return scale, bias


# --------------------------------------------------------------------------
# One fused kernel: expand 1x1 + BN + SiLU  ->  depthwise KxK + BN + SiLU
#                   ->  squeeze-excitation  ->  project 1x1 + BN + residual
# One grid step == one image; everything stays in vregs/VMEM (no scratch).
# Layout: channels on sublanes, flattened H*W on the 128-lane axis.
# --------------------------------------------------------------------------
def _mbconv_kernel(x_ref, mask_ref, w1_ref, b1_ref, wdw_ref, bdw_ref,
                   sw1_ref, sb1_ref, sw2_ref, sb2_ref,
                   w3_ref, b3_ref, o_ref, *, H, W, K):
    HW = H * W
    pad = (K - 1) // 2

    x = x_ref[0]                                     # (Cin, HW) f32 (kept f32 for residual)
    Cexp = w1_ref.shape[0]

    def sigmoid(v):                                  # exp + approx recip -> both on EUP
        return pl.reciprocal(1.0 + jnp.exp(-v), approx=True)

    def silu(v):
        return v * sigmoid(v)

    # ---- expand 1x1 conv (BN scale folded into w1) + SiLU ------------------
    ex = jnp.dot(w1_ref[...], x.astype(jnp.bfloat16),
                 preferred_element_type=jnp.float32)             # (Cexp, HW)
    ex = silu(ex + b1_ref[...])

    # ---- depthwise KxK conv (BN folded) + SiLU ------------------------------
    # SAME padding realised as lane rolls of the flattened row-major H*W axis
    # plus precomputed 0/1 edge masks: no padded scratch, no zero fill, no
    # misaligned slices; rolls use the idle XLU slot.
    acc = jnp.zeros((Cexp, HW), jnp.float32)
    for kh in range(K):
        dh = kh - pad
        for kw in range(K):
            dwo = kw - pad
            t = kh * K + kw
            s = dh * W + dwo                                      # flat tap offset
            tap = ex if s == 0 else pltpu.roll(ex, (-s) % HW, axis=1)
            if s != 0:
                tap = tap * mask_ref[t]                           # (1, HW) 0/1 edge mask
            acc = acc + tap * wdw_ref[t]                          # (Cexp, 1) per-channel tap
    dw_act = silu(acc + bdw_ref[...])                             # (Cexp, HW)

    # ---- squeeze-excitation (pool -> fc1+SiLU -> fc2+sigmoid) ---------------
    s_col = jnp.sum(dw_act, axis=1, keepdims=True) * (1.0 / HW)   # (Cexp, 1)
    h = silu(jnp.dot(sw1_ref[...], s_col,
                     preferred_element_type=jnp.float32) + sb1_ref[...])   # (Csq, 1)
    g = sigmoid(jnp.dot(sw2_ref[...], h,
                        preferred_element_type=jnp.float32) + sb2_ref[...])  # (Cexp, 1)

    # ---- fold gate into projection weight, project, add residual -----------
    # w3g = w3 @ diag(g) scales the Cexp columns of w3 by the gate; the tiny
    # lane<->sublane move of g rides the MXU instead of rescaling the whole
    # (Cexp, HW) activation (HW/Cout x fewer VPU ops for the gating stage).
    ii = jax.lax.broadcasted_iota(jnp.int32, (Cexp, Cexp), 0)
    jj = jax.lax.broadcasted_iota(jnp.int32, (Cexp, Cexp), 1)
    diag_g = jnp.where(ii == jj, g, 0.0)                          # (Cexp, Cexp)
    w3g = jnp.dot(w3_ref[...], diag_g, preferred_element_type=jnp.float32)

    out = jnp.dot(w3g.astype(jnp.bfloat16), dw_act.astype(jnp.bfloat16),
                  preferred_element_type=jnp.float32)             # (Cout, HW)
    out = out + b3_ref[...] + x                                   # bias + identity shortcut
    o_ref[...] = out.reshape((1,) + out.shape)


# --------------------------------------------------------------------------
# MBConv forward (stride=1, has_short_cut=True, eval mode => DropPath = id)
# Input/output are NCHW like the PyTorch module.
# --------------------------------------------------------------------------
def mbconv_forward(x_nchw, p, *, kernel_size=3):
    x = x_nchw.astype(jnp.float32)
    N, Cin, H, W = x.shape
    K = kernel_size
    pad = (K - 1) // 2
    HW = H * W
    Cexp = p["expand_w"].shape[1]
    Csq = p["se_w1"].shape[1]
    Cout = p["project_w"].shape[1]
    assert Cin == Cout, "only the stride=1 / has_short_cut config is built"
    assert HW % 128 == 0, "flattened spatial axis must be a multiple of 128"

    # Fold BN running stats into the conv weights at trace time (tiny tensors).
    s_e, b_e = _fold_bn(p["bn1_g"], p["bn1_b"], p["bn1_m"], p["bn1_v"])
    s_d, b_d = _fold_bn(p["bn2_g"], p["bn2_b"], p["bn2_m"], p["bn2_v"])
    s_p, b_p = _fold_bn(p["bn3_g"], p["bn3_b"], p["bn3_m"], p["bn3_v"])

    # Channel-first weights; big-matmul operands stored/DMA'd as bf16.
    w1cf = (p["expand_w"] * s_e[None, :]).T.astype(jnp.bfloat16)            # (Cexp, Cin)
    wdw_cf = (p["dw_w"] * s_d[None, None, :]).reshape(K * K, Cexp)[..., None]  # (K*K, Cexp, 1)
    w3cf = (p["project_w"] * s_p[None, :]).T.astype(jnp.float32)            # (Cout, Cexp)
    sw1t = p["se_w1"].T.astype(jnp.float32)                                  # (Csq, Cexp)
    sw2t = p["se_w2"].T.astype(jnp.float32)                                  # (Cexp, Csq)

    x2d = x.reshape(N, Cin, HW)

    # Precomputed SAME-padding edge masks for the K*K lane-rolled taps.
    lane = np.arange(HW)
    r_idx, c_idx = lane // W, lane % W
    masks_np = np.zeros((K * K, 1, HW), np.float32)
    for kh in range(K):
        for kw in range(K):
            dh, dwo = kh - pad, kw - pad
            ok = ((r_idx + dh >= 0) & (r_idx + dh < H) &
                  (c_idx + dwo >= 0) & (c_idx + dwo < W))
            masks_np[kh * K + kw, 0, :] = ok
    masks = jnp.asarray(masks_np)

    # Cost estimate: weights counted once (constant index_maps => single DMA).
    flops = int(N * HW * 2 * Cexp * (Cin + K * K + Cout)
                + N * (4 * Cexp * Csq + 2 * Cout * Cexp * Cexp))
    transcendentals = int(N * (4 * HW * Cexp + 2 * Cexp + 2 * Csq))
    weight_bytes = int(2 * w1cf.size
                       + 4 * (wdw_cf.size + w3cf.size + sw1t.size + sw2t.size
                              + masks.size + 2 * Cexp + Csq + Cout))
    bytes_accessed = int(4 * x2d.size + 4 * N * Cout * HW + weight_bytes)

    kernel = functools.partial(_mbconv_kernel, H=H, W=W, K=K)
    out2d = pl.pallas_call(
        kernel,
        out_shape=jax.ShapeDtypeStruct((N, Cout, HW), jnp.float32),
        grid=(N,),
        in_specs=[
            pl.BlockSpec((1, Cin, HW), lambda n: (n, 0, 0)),       # x (NCHW, flattened)
            pl.BlockSpec((K * K, 1, HW), lambda n: (0, 0, 0)),     # depthwise edge masks
            pl.BlockSpec((Cexp, Cin), lambda n: (0, 0)),           # expand w (folded, bf16)
            pl.BlockSpec((Cexp, 1), lambda n: (0, 0)),             # expand bias
            pl.BlockSpec((K * K, Cexp, 1), lambda n: (0, 0, 0)),   # dw w (folded)
            pl.BlockSpec((Cexp, 1), lambda n: (0, 0)),             # dw bias
            pl.BlockSpec((Csq, Cexp), lambda n: (0, 0)),           # se fc1 w (transposed)
            pl.BlockSpec((Csq, 1), lambda n: (0, 0)),              # se fc1 b
            pl.BlockSpec((Cexp, Csq), lambda n: (0, 0)),           # se fc2 w (transposed)
            pl.BlockSpec((Cexp, 1), lambda n: (0, 0)),             # se fc2 b
            pl.BlockSpec((Cout, Cexp), lambda n: (0, 0)),          # project w (folded)
            pl.BlockSpec((Cout, 1), lambda n: (0, 0)),             # project bias
        ],
        out_specs=pl.BlockSpec((1, Cout, HW), lambda n: (n, 0, 0)),
        compiler_params=pltpu.CompilerParams(
            dimension_semantics=("parallel",),
            vmem_limit_bytes=32 * 1024 * 1024),
        cost_estimate=pl.CostEstimate(flops=flops,
                                      transcendentals=transcendentals,
                                      bytes_accessed=bytes_accessed),
    )(x2d, masks, w1cf, b_e.reshape(Cexp, 1), wdw_cf, b_d.reshape(Cexp, 1),
      sw1t, p["se_b1"].reshape(Csq, 1), sw2t, p["se_b2"].reshape(Cexp, 1),
      w3cf, b_p.reshape(Cout, 1))

    return out2d.reshape(N, Cout, H, W)                           # NCHW


# --------------------------------------------------------------------------
# Pure-jnp reference (same folded-BN inference math) for a sanity check
# --------------------------------------------------------------------------
def mbconv_reference(x_nchw, p, *, kernel_size=3):
    x = jnp.transpose(x_nchw, (0, 2, 3, 1)).astype(jnp.float32)
    N, H, W, Cin = x.shape
    silu = lambda v: v * jax.nn.sigmoid(v)

    s_e, b_e = _fold_bn(p["bn1_g"], p["bn1_b"], p["bn1_m"], p["bn1_v"])
    h = silu(jnp.einsum("nhwc,cd->nhwd", x, p["expand_w"]) * s_e + b_e)

    K = kernel_size
    pad = (K - 1) // 2
    xp = jnp.pad(h, ((0, 0), (pad, pad), (pad, pad), (0, 0)))
    acc = jnp.zeros_like(h)
    for kh in range(K):
        for kw in range(K):
            acc = acc + xp[:, kh:kh + H, kw:kw + W, :] * p["dw_w"][kh, kw, :]
    s_d, b_d = _fold_bn(p["bn2_g"], p["bn2_b"], p["bn2_m"], p["bn2_v"])
    h = silu(acc * s_d + b_d)

    s = jnp.mean(h, axis=(1, 2))                       # (N, Cexp)
    g = silu(s @ p["se_w1"] + p["se_b1"])
    g = jax.nn.sigmoid(g @ p["se_w2"] + p["se_b2"])
    h = h * g[:, None, None, :]

    s_p, b_p = _fold_bn(p["bn3_g"], p["bn3_b"], p["bn3_m"], p["bn3_v"])
    out = jnp.einsum("nhwc,cd->nhwd", h, p["project_w"]) * s_p + b_p + x
    return jnp.transpose(out, (0, 3, 1, 2))


# --------------------------------------------------------------------------
def make_params(key, cin, cout, expand_ratio, kernel_size, se_ratio):
    cexp = cin * expand_ratio
    csq = int(cin * se_ratio)
    keys = jax.random.split(key, 12)
    rnd = lambda k, shp, scl=0.1: scl * jax.random.normal(k, shp, jnp.float32)
    return dict(
        expand_w=rnd(keys[0], (cin, cexp)),
        bn1_g=1.0 + rnd(keys[1], (cexp,)), bn1_b=rnd(keys[1], (cexp,)),
        bn1_m=rnd(keys[2], (cexp,)), bn1_v=1.0 + 0.1 * jnp.abs(rnd(keys[2], (cexp,))),
        dw_w=rnd(keys[3], (kernel_size, kernel_size, cexp)),
        bn2_g=1.0 + rnd(keys[4], (cexp,)), bn2_b=rnd(keys[4], (cexp,)),
        bn2_m=rnd(keys[5], (cexp,)), bn2_v=1.0 + 0.1 * jnp.abs(rnd(keys[5], (cexp,))),
        se_w1=rnd(keys[6], (cexp, csq)), se_b1=rnd(keys[7], (csq,)),
        se_w2=rnd(keys[8], (csq, cexp)), se_b2=rnd(keys[9], (cexp,)),
        project_w=rnd(keys[10], (cexp, cout)),
        bn3_g=1.0 + rnd(keys[11], (cout,)), bn3_b=rnd(keys[11], (cout,)),
        bn3_m=rnd(keys[11], (cout,)), bn3_v=1.0 + 0.1 * jnp.abs(rnd(keys[11], (cout,))),
    )


if __name__ == "__main__":
    # MBConv(input_channel=16, output_channel=16, kernel_size=3, expand_ratio=4,
    #        stride=1, se_ratio=0.25, drop_rate=0.2) in eval mode.
    key = jax.random.PRNGKey(0)
    k_x, k_p = jax.random.split(key)
    N, C, H, W = 2, 16, 8, 16            # H*W = 128 -> one full lane row per channel
    x = jax.random.normal(k_x, (N, C, H, W), jnp.float32)   # NCHW like PyTorch
    params = make_params(k_p, cin=C, cout=C, expand_ratio=4,
                         kernel_size=3, se_ratio=0.25)

    out = mbconv_forward(x, params, kernel_size=3)
    out = jax.block_until_ready(out)

    ref = mbconv_reference(x, params, kernel_size=3)
    assert out.shape == (N, C, H, W)
    max_err = float(jnp.max(jnp.abs(out - ref)))
    # Tolerance accounts for bf16 MXU operands + EUP approx-reciprocal sigmoid.
    assert jnp.allclose(out, ref, rtol=2e-2, atol=2e-2), max_err
    print("KERNEL_OK")
</pallas_src>

<mosaic_0001>
module attributes {stable_mosaic.version = 11 : i64} {
  func.func @_mbconv_kernel(%arg0: i32, %arg1: memref<1x16x128xf32, #tpu.memory_space<vmem>>, %arg2: memref<9x1x128xf32, #tpu.memory_space<vmem>>, %arg3: memref<64x16xbf16, #tpu.memory_space<vmem>>, %arg4: memref<64x1xf32, #tpu.memory_space<vmem>>, %arg5: memref<9x64x1xf32, #tpu.memory_space<vmem>>, %arg6: memref<64x1xf32, #tpu.memory_space<vmem>>, %arg7: memref<4x64xf32, #tpu.memory_space<vmem>>, %arg8: memref<4x1xf32, #tpu.memory_space<vmem>>, %arg9: memref<64x4xf32, #tpu.memory_space<vmem>>, %arg10: memref<64x1xf32, #tpu.memory_space<vmem>>, %arg11: memref<16x64xf32, #tpu.memory_space<vmem>>, %arg12: memref<16x1xf32, #tpu.memory_space<vmem>>, %arg13: memref<1x16x128xf32, #tpu.memory_space<vmem>>) attributes {dimension_semantics = [#tpu.dimension_semantics<parallel>], iteration_bounds = array<i64: 2>, scalar_prefetch = 0 : i64, scratch_operands = 0 : i64, tpu.core_type = #tpu.core_type<tc>, window_params = [{transform_indices = @transform_0, window_bounds = array<i64: 1, 16, 128>}, {pipeline_mode = #tpu.pipeline_mode<synchronous>, transform_indices = @transform_1, window_bounds = array<i64: 9, 1, 128>}, {pipeline_mode = #tpu.pipeline_mode<synchronous>, transform_indices = @transform_2, window_bounds = array<i64: 64, 16>}, {pipeline_mode = #tpu.pipeline_mode<synchronous>, transform_indices = @transform_3, window_bounds = array<i64: 64, 1>}, {pipeline_mode = #tpu.pipeline_mode<synchronous>, transform_indices = @transform_4, window_bounds = array<i64: 9, 64, 1>}, {pipeline_mode = #tpu.pipeline_mode<synchronous>, transform_indices = @transform_5, window_bounds = array<i64: 64, 1>}, {pipeline_mode = #tpu.pipeline_mode<synchronous>, transform_indices = @transform_6, window_bounds = array<i64: 4, 64>}, {pipeline_mode = #tpu.pipeline_mode<synchronous>, transform_indices = @transform_7, window_bounds = array<i64: 4, 1>}, {pipeline_mode = #tpu.pipeline_mode<synchronous>, transform_indices = @transform_8, window_bounds = array<i64: 64, 4>}, {pipeline_mode = #tpu.pipeline_mode<synchronous>, transform_indices = @transform_9, window_bounds = array<i64: 64, 1>}, {pipeline_mode = #tpu.pipeline_mode<synchronous>, transform_indices = @transform_10, window_bounds = array<i64: 16, 64>}, {pipeline_mode = #tpu.pipeline_mode<synchronous>, transform_indices = @transform_11, window_bounds = array<i64: 16, 1>}, {transform_indices = @transform_12, window_bounds = array<i64: 1, 16, 128>}]} {
    %c0 = arith.constant 0 : index
    %c0_0 = arith.constant 0 : index
    %c0_1 = arith.constant 0 : index
    %0 = vector.load %arg1[%c0, %c0_0, %c0_1] : memref<1x16x128xf32, #tpu.memory_space<vmem>>, vector<1x16x128xf32>
    %1 = vector.shape_cast %0 : vector<1x16x128xf32> to vector<16x128xf32>
    %c0_2 = arith.constant 0 : index
    %c0_3 = arith.constant 0 : index
    %2 = vector.load %arg3[%c0_2, %c0_3] : memref<64x16xbf16, #tpu.memory_space<vmem>>, vector<64x16xbf16>
    %3 = arith.truncf %1 : vector<16x128xf32> to vector<16x128xbf16>
    %cst = arith.constant dense<0.000000e+00> : vector<64x128xf32>
    %4 = tpu.matmul %2, %3, %cst {dimension_numbers = #tpu.dot_dimension_numbers<[1], [0], [0], [1], [0, 0, 1, 1], [], []>} : vector<64x16xbf16>, vector<16x128xbf16>, vector<64x128xf32> -> vector<64x128xf32>
    %c0_4 = arith.constant 0 : index
    %c0_5 = arith.constant 0 : index
    %5 = vector.load %arg4[%c0_4, %c0_5] : memref<64x1xf32, #tpu.memory_space<vmem>>, vector<64x1xf32>
    %6 = vector.broadcast %5 : vector<64x1xf32> to vector<64x128xf32>
    %7 = arith.addf %4, %6 : vector<64x128xf32>
    %cst_6 = arith.constant 0.000000e+00 : f32
    %8 = vector.broadcast %cst_6 : f32 to vector<64x128xf32>
    %9 = arith.subf %8, %7 : vector<64x128xf32>
    %10 = math.exp %9 : vector<64x128xf32>
    %cst_7 = arith.constant 1.000000e+00 : f32
    %11 = vector.broadcast %cst_7 : f32 to vector<64x128xf32>
    %12 = arith.addf %11, %10 : vector<64x128xf32>
    %13 = tpu.reciprocal %12 {approx = true} : vector<64x128xf32> -> vector<64x128xf32>
    %14 = arith.mulf %7, %13 : vector<64x128xf32>
    %cst_8 = arith.constant 0.000000e+00 : f32
    %15 = vector.broadcast %cst_8 : f32 to vector<64x128xf32>
    %c17_i32 = arith.constant 17 : i32
    %16 = tpu.dynamic_rotate %14 by %c17_i32 dim 1 : vector<64x128xf32>, i32 -> vector<64x128xf32>
    %c0_9 = arith.constant 0 : index
    %c0_10 = arith.constant 0 : index
    %c0_11 = arith.constant 0 : index
    %17 = vector.load %arg2[%c0_9, %c0_10, %c0_11] : memref<9x1x128xf32, #tpu.memory_space<vmem>>, vector<1x1x128xf32>
    %18 = vector.shape_cast %17 : vector<1x1x128xf32> to vector<1x128xf32>
    %19 = vector.broadcast %18 : vector<1x128xf32> to vector<64x128xf32>
    %20 = arith.mulf %16, %19 : vector<64x128xf32>
    %c0_12 = arith.constant 0 : index
    %c0_13 = arith.constant 0 : index
    %c0_14 = arith.constant 0 : index
    %21 = vector.load %arg5[%c0_12, %c0_13, %c0_14] : memref<9x64x1xf32, #tpu.memory_space<vmem>>, vector<1x64x1xf32>
    %22 = vector.shape_cast %21 : vector<1x64x1xf32> to vector<64x1xf32>
    %23 = vector.broadcast %22 : vector<64x1xf32> to vector<64x128xf32>
    %24 = arith.mulf %20, %23 : vector<64x128xf32>
    %25 = arith.addf %15, %24 : vector<64x128xf32>
    %c16_i32 = arith.constant 16 : i32
    %26 = tpu.dynamic_rotate %14 by %c16_i32 dim 1 : vector<64x128xf32>, i32 -> vector<64x128xf32>
    %c1 = arith.constant 1 : index
    %c0_15 = arith.constant 0 : index
    %c0_16 = arith.constant 0 : index
    %27 = vector.load %arg2[%c1, %c0_15, %c0_16] : memref<9x1x128xf32, #tpu.memory_space<vmem>>, vector<1x1x128xf32>
    %28 = vector.shape_cast %27 : vector<1x1x128xf32> to vector<1x128xf32>
    %29 = vector.broadcast %28 : vector<1x128xf32> to vector<64x128xf32>
    %30 = arith.mulf %26, %29 : vector<64x128xf32>
    %c1_17 = arith.constant 1 : index
    %c0_18 = arith.constant 0 : index
    %c0_19 = arith.constant 0 : index
    %31 = vector.load %arg5[%c1_17, %c0_18, %c0_19] : memref<9x64x1xf32, #tpu.memory_space<vmem>>, vector<1x64x1xf32>
    %32 = vector.shape_cast %31 : vector<1x64x1xf32> to vector<64x1xf32>
    %33 = vector.broadcast %32 : vector<64x1xf32> to vector<64x128xf32>
    %34 = arith.mulf %30, %33 : vector<64x128xf32>
    %35 = arith.addf %25, %34 : vector<64x128xf32>
    %c15_i32 = arith.constant 15 : i32
    %36 = tpu.dynamic_rotate %14 by %c15_i32 dim 1 : vector<64x128xf32>, i32 -> vector<64x128xf32>
    %c2 = arith.constant 2 : index
    %c0_20 = arith.constant 0 : index
    %c0_21 = arith.constant 0 : index
    %37 = vector.load %arg2[%c2, %c0_20, %c0_21] : memref<9x1x128xf32, #tpu.memory_space<vmem>>, vector<1x1x128xf32>
    %38 = vector.shape_cast %37 : vector<1x1x128xf32> to vector<1x128xf32>
    %39 = vector.broadcast %38 : vector<1x128xf32> to vector<64x128xf32>
    %40 = arith.mulf %36, %39 : vector<64x128xf32>
    %c2_22 = arith.constant 2 : index
    %c0_23 = arith.constant 0 : index
    %c0_24 = arith.constant 0 : index
    %41 = vector.load %arg5[%c2_22, %c0_23, %c0_24] : memref<9x64x1xf32, #tpu.memory_space<vmem>>, vector<1x64x1xf32>
    %42 = vector.shape_cast %41 : vector<1x64x1xf32> to vector<64x1xf32>
    %43 = vector.broadcast %42 : vector<64x1xf32> to vector<64x128xf32>
    %44 = arith.mulf %40, %43 : vector<64x128xf32>
    %45 = arith.addf %35, %44 : vector<64x128xf32>
    %c1_i32 = arith.constant 1 : i32
    %46 = tpu.dynamic_rotate %14 by %c1_i32 dim 1 : vector<64x128xf32>, i32 -> vector<64x128xf32>
    %c3 = arith.constant 3 : index
    %c0_25 = arith.constant 0 : index
    %c0_26 = arith.constant 0 : index
    %47 = vector.load %arg2[%c3, %c0_25, %c0_26] : memref<9x1x128xf32, #tpu.memory_space<vmem>>, vector<1x1x128xf32>
    %48 = vector.shape_cast %47 : vector<1x1x128xf32> to vector<1x128xf32>
    %49 = vector.broadcast %48 : vector<1x128xf32> to vector<64x128xf32>
    %50 = arith.mulf %46, %49 : vector<64x128xf32>
    %c3_27 = arith.constant 3 : index
    %c0_28 = arith.constant 0 : index
    %c0_29 = arith.constant 0 : index
    %51 = vector.load %arg5[%c3_27, %c0_28, %c0_29] : memref<9x64x1xf32, #tpu.memory_space<vmem>>, vector<1x64x1xf32>
    %52 = vector.shape_cast %51 : vector<1x64x1xf32> to vector<64x1xf32>
    %53 = vector.broadcast %52 : vector<64x1xf32> to vector<64x128xf32>
    %54 = arith.mulf %50, %53 : vector<64x128xf32>
    %55 = arith.addf %45, %54 : vector<64x128xf32>
    %c4 = arith.constant 4 : index
    %c0_30 = arith.constant 0 : index
    %c0_31 = arith.constant 0 : index
    %56 = vector.load %arg5[%c4, %c0_30, %c0_31] : memref<9x64x1xf32, #tpu.memory_space<vmem>>, vector<1x64x1xf32>
    %57 = vector.shape_cast %56 : vector<1x64x1xf32> to vector<64x1xf32>
    %58 = vector.broadcast %57 : vector<64x1xf32> to vector<64x128xf32>
    %59 = arith.mulf %14, %58 : vector<64x128xf32>
    %60 = arith.addf %55, %59 : vector<64x128xf32>
    %c127_i32 = arith.constant 127 : i32
    %61 = tpu.dynamic_rotate %14 by %c127_i32 dim 1 : vector<64x128xf32>, i32 -> vector<64x128xf32>
    %c5 = arith.constant 5 : index
    %c0_32 = arith.constant 0 : index
    %c0_33 = arith.constant 0 : index
    %62 = vector.load %arg2[%c5, %c0_32, %c0_33] : memref<9x1x128xf32, #tpu.memory_space<vmem>>, vector<1x1x128xf32>
    %63 = vector.shape_cast %62 : vector<1x1x128xf32> to vector<1x128xf32>
    %64 = vector.broadcast %63 : vector<1x128xf32> to vector<64x128xf32>
    %65 = arith.mulf %61, %64 : vector<64x128xf32>
    %c5_34 = arith.constant 5 : index
    %c0_35 = arith.constant 0 : index
    %c0_36 = arith.constant 0 : index
    %66 = vector.load %arg5[%c5_34, %c0_35, %c0_36] : memref<9x64x1xf32, #tpu.memory_space<vmem>>, vector<1x64x1xf32>
    %67 = vector.shape_cast %66 : vector<1x64x1xf32> to vector<64x1xf32>
    %68 = vector.broadcast %67 : vector<64x1xf32> to vector<64x128xf32>
    %69 = arith.mulf %65, %68 : vector<64x128xf32>
    %70 = arith.addf %60, %69 : vector<64x128xf32>
    %c113_i32 = arith.constant 113 : i32
    %71 = tpu.dynamic_rotate %14 by %c113_i32 dim 1 : vector<64x128xf32>, i32 -> vector<64x128xf32>
    %c6 = arith.constant 6 : index
    %c0_37 = arith.constant 0 : index
    %c0_38 = arith.constant 0 : index
    %72 = vector.load %arg2[%c6, %c0_37, %c0_38] : memref<9x1x128xf32, #tpu.memory_space<vmem>>, vector<1x1x128xf32>
    %73 = vector.shape_cast %72 : vector<1x1x128xf32> to vector<1x128xf32>
    %74 = vector.broadcast %73 : vector<1x128xf32> to vector<64x128xf32>
    %75 = arith.mulf %71, %74 : vector<64x128xf32>
    %c6_39 = arith.constant 6 : index
    %c0_40 = arith.constant 0 : index
    %c0_41 = arith.constant 0 : index
    %76 = vector.load %arg5[%c6_39, %c0_40, %c0_41] : memref<9x64x1xf32, #tpu.memory_space<vmem>>, vector<1x64x1xf32>
    %77 = vector.shape_cast %76 : vector<1x64x1xf32> to vector<64x1xf32>
    %78 = vector.broadcast %77 : vector<64x1xf32> to vector<64x128xf32>
    %79 = arith.mulf %75, %78 : vector<64x128xf32>
    %80 = arith.addf %70, %79 : vector<64x128xf32>
    %c112_i32 = arith.constant 112 : i32
    %81 = tpu.dynamic_rotate %14 by %c112_i32 dim 1 : vector<64x128xf32>, i32 -> vector<64x128xf32>
    %c7 = arith.constant 7 : index
    %c0_42 = arith.constant 0 : index
    %c0_43 = arith.constant 0 : index
    %82 = vector.load %arg2[%c7, %c0_42, %c0_43] : memref<9x1x128xf32, #tpu.memory_space<vmem>>, vector<1x1x128xf32>
    %83 = vector.shape_cast %82 : vector<1x1x128xf32> to vector<1x128xf32>
    %84 = vector.broadcast %83 : vector<1x128xf32> to vector<64x128xf32>
    %85 = arith.mulf %81, %84 : vector<64x128xf32>
    %c7_44 = arith.constant 7 : index
    %c0_45 = arith.constant 0 : index
    %c0_46 = arith.constant 0 : index
    %86 = vector.load %arg5[%c7_44, %c0_45, %c0_46] : memref<9x64x1xf32, #tpu.memory_space<vmem>>, vector<1x64x1xf32>
    %87 = vector.shape_cast %86 : vector<1x64x1xf32> to vector<64x1xf32>
    %88 = vector.broadcast %87 : vector<64x1xf32> to vector<64x128xf32>
    %89 = arith.mulf %85, %88 : vector<64x128xf32>
    %90 = arith.addf %80, %89 : vector<64x128xf32>
    %c111_i32 = arith.constant 111 : i32
    %91 = tpu.dynamic_rotate %14 by %c111_i32 dim 1 : vector<64x128xf32>, i32 -> vector<64x128xf32>
    %c8 = arith.constant 8 : index
    %c0_47 = arith.constant 0 : index
    %c0_48 = arith.constant 0 : index
    %92 = vector.load %arg2[%c8, %c0_47, %c0_48] : memref<9x1x128xf32, #tpu.memory_space<vmem>>, vector<1x1x128xf32>
    %93 = vector.shape_cast %92 : vector<1x1x128xf32> to vector<1x128xf32>
    %94 = vector.broadcast %93 : vector<1x128xf32> to vector<64x128xf32>
    %95 = arith.mulf %91, %94 : vector<64x128xf32>
    %c8_49 = arith.constant 8 : index
    %c0_50 = arith.constant 0 : index
    %c0_51 = arith.constant 0 : index
    %96 = vector.load %arg5[%c8_49, %c0_50, %c0_51] : memref<9x64x1xf32, #tpu.memory_space<vmem>>, vector<1x64x1xf32>
    %97 = vector.shape_cast %96 : vector<1x64x1xf32> to vector<64x1xf32>
    %98 = vector.broadcast %97 : vector<64x1xf32> to vector<64x128xf32>
    %99 = arith.mulf %95, %98 : vector<64x128xf32>
    %100 = arith.addf %90, %99 : vector<64x128xf32>
    %c0_52 = arith.constant 0 : index
    %c0_53 = arith.constant 0 : index
    %101 = vector.load %arg6[%c0_52, %c0_53] : memref<64x1xf32, #tpu.memory_space<vmem>>, vector<64x1xf32>
    %102 = vector.broadcast %101 : vector<64x1xf32> to vector<64x128xf32>
    %103 = arith.addf %100, %102 : vector<64x128xf32>
    %cst_54 = arith.constant 0.000000e+00 : f32
    %104 = vector.broadcast %cst_54 : f32 to vector<64x128xf32>
    %105 = arith.subf %104, %103 : vector<64x128xf32>
    %106 = math.exp %105 : vector<64x128xf32>
    %cst_55 = arith.constant 1.000000e+00 : f32
    %107 = vector.broadcast %cst_55 : f32 to vector<64x128xf32>
    %108 = arith.addf %107, %106 : vector<64x128xf32>
    %109 = tpu.reciprocal %108 {approx = true} : vector<64x128xf32> -> vector<64x128xf32>
    %110 = arith.mulf %103, %109 : vector<64x128xf32>
    %cst_56 = arith.constant dense<0.000000e+00> : vector<64xf32>
    %111 = vector.multi_reduction <add>, %110, %cst_56 [1] : vector<64x128xf32> to vector<64xf32>
    %112 = vector.shape_cast %111 : vector<64xf32> to vector<64x1xf32>
    %cst_57 = arith.constant 7.812500e-03 : f32
    %113 = vector.broadcast %cst_57 : f32 to vector<64x1xf32>
    %114 = arith.mulf %112, %113 : vector<64x1xf32>
    %c0_58 = arith.constant 0 : index
    %c0_59 = arith.constant 0 : index
    %115 = vector.load %arg7[%c0_58, %c0_59] : memref<4x64xf32, #tpu.memory_space<vmem>>, vector<4x64xf32>
    %cst_60 = arith.constant dense<0.000000e+00> : vector<4x1xf32>
    %116 = tpu.matmul %115, %114, %cst_60 {dimension_numbers = #tpu.dot_dimension_numbers<[1], [0], [0], [1], [0, 0, 1, 1], [], []>} : vector<4x64xf32>, vector<64x1xf32>, vector<4x1xf32> -> vector<4x1xf32>
    %c0_61 = arith.constant 0 : index
    %c0_62 = arith.constant 0 : index
    %117 = vector.load %arg8[%c0_61, %c0_62] : memref<4x1xf32, #tpu.memory_space<vmem>>, vector<4x1xf32>
    %118 = arith.addf %116, %117 : vector<4x1xf32>
    %cst_63 = arith.constant 0.000000e+00 : f32
    %119 = vector.broadcast %cst_63 : f32 to vector<4x1xf32>
    %120 = arith.subf %119, %118 : vector<4x1xf32>
    %121 = math.exp %120 : vector<4x1xf32>
    %cst_64 = arith.constant 1.000000e+00 : f32
    %122 = vector.broadcast %cst_64 : f32 to vector<4x1xf32>
    %123 = arith.addf %122, %121 : vector<4x1xf32>
    %124 = tpu.reciprocal %123 {approx = true} : vector<4x1xf32> -> vector<4x1xf32>
    %125 = arith.mulf %118, %124 : vector<4x1xf32>
    %c0_65 = arith.constant 0 : index
    %c0_66 = arith.constant 0 : index
    %126 = vector.load %arg9[%c0_65, %c0_66] : memref<64x4xf32, #tpu.memory_space<vmem>>, vector<64x4xf32>
    %cst_67 = arith.constant dense<0.000000e+00> : vector<64x1xf32>
    %127 = tpu.matmul %126, %125, %cst_67 {dimension_numbers = #tpu.dot_dimension_numbers<[1], [0], [0], [1], [0, 0, 1, 1], [], []>} : vector<64x4xf32>, vector<4x1xf32>, vector<64x1xf32> -> vector<64x1xf32>
    %c0_68 = arith.constant 0 : index
    %c0_69 = arith.constant 0 : index
    %128 = vector.load %arg10[%c0_68, %c0_69] : memref<64x1xf32, #tpu.memory_space<vmem>>, vector<64x1xf32>
    %129 = arith.addf %127, %128 : vector<64x1xf32>
    %cst_70 = arith.constant 0.000000e+00 : f32
    %130 = vector.broadcast %cst_70 : f32 to vector<64x1xf32>
    %131 = arith.subf %130, %129 : vector<64x1xf32>
    %132 = math.exp %131 : vector<64x1xf32>
    %cst_71 = arith.constant 1.000000e+00 : f32
    %133 = vector.broadcast %cst_71 : f32 to vector<64x1xf32>
    %134 = arith.addf %133, %132 : vector<64x1xf32>
    %135 = tpu.reciprocal %134 {approx = true} : vector<64x1xf32> -> vector<64x1xf32>
    %136 = tpu.iota {dimensions = array<i32: 0>} : vector<64x64xi32>
    %137 = tpu.iota {dimensions = array<i32: 1>} : vector<64x64xi32>
    %138 = arith.cmpi eq, %136, %137 : vector<64x64xi32>
    %cst_72 = arith.constant 0.000000e+00 : f32
    %139 = vector.shape_cast %135 : vector<64x1xf32> to vector<64x1xf32>
    %140 = vector.broadcast %139 : vector<64x1xf32> to vector<64x64xf32>
    %141 = vector.broadcast %cst_72 : f32 to vector<64x64xf32>
    %142 = arith.select %138, %140, %141 : vector<64x64xi1>, vector<64x64xf32>
    %c0_73 = arith.constant 0 : index
    %c0_74 = arith.constant 0 : index
    %143 = vector.load %arg11[%c0_73, %c0_74] : memref<16x64xf32, #tpu.memory_space<vmem>>, vector<16x64xf32>
    %cst_75 = arith.constant dense<0.000000e+00> : vector<16x64xf32>
    %144 = tpu.matmul %143, %142, %cst_75 {dimension_numbers = #tpu.dot_dimension_numbers<[1], [0], [0], [1], [0, 0, 1, 1], [], []>} : vector<16x64xf32>, vector<64x64xf32>, vector<16x64xf32> -> vector<16x64xf32>
    %145 = arith.truncf %144 : vector<16x64xf32> to vector<16x64xbf16>
    %146 = arith.truncf %110 : vector<64x128xf32> to vector<64x128xbf16>
    %cst_76 = arith.constant dense<0.000000e+00> : vector<16x128xf32>
    %147 = tpu.matmul %145, %146, %cst_76 {dimension_numbers = #tpu.dot_dimension_numbers<[1], [0], [0], [1], [0, 0, 1, 1], [], []>} : vector<16x64xbf16>, vector<64x128xbf16>, vector<16x128xf32> -> vector<16x128xf32>
    %c0_77 = arith.constant 0 : index
    %c0_78 = arith.constant 0 : index
    %148 = vector.load %arg12[%c0_77, %c0_78] : memref<16x1xf32, #tpu.memory_space<vmem>>, vector<16x1xf32>
    %149 = vector.broadcast %148 : vector<16x1xf32> to vector<16x128xf32>
    %150 = arith.addf %147, %149 : vector<16x128xf32>
    %151 = arith.addf %150, %1 : vector<16x128xf32>
    %152 = vector.shape_cast %151 : vector<16x128xf32> to vector<1x16x128xf32>
    %c0_79 = arith.constant 0 : index
    %c0_80 = arith.constant 0 : index
    %c0_81 = arith.constant 0 : index
    %153 = vector.load %arg13[%c0_79, %c0_80, %c0_81] : memref<1x16x128xf32, #tpu.memory_space<vmem>>, vector<1x16x128xf32>
    tpu.vector_store %arg13[%c0_79, %c0_80, %c0_81], %152 {strides = array<i32>} : memref<1x16x128xf32, #tpu.memory_space<vmem>>, vector<1x16x128xf32>,
    return
  }
  func.func @transform_0(%arg0: i32) -> (i32, i32, i32) {
    %c0_i32 = arith.constant 0 : i32
    %c0_i32_0 = arith.constant 0 : i32
    %c0_i32_1 = arith.constant 0 : i32
    return %arg0, %c0_i32, %c0_i32_0 : i32, i32, i32
  }
  func.func @transform_1(%arg0: i32) -> (i32, i32, i32) {
    %c0_i32 = arith.constant 0 : i32
    %c0_i32_0 = arith.constant 0 : i32
    %c0_i32_1 = arith.constant 0 : i32
    %c0_i32_2 = arith.constant 0 : i32
    return %c0_i32, %c0_i32_0, %c0_i32_1 : i32, i32, i32
  }
  func.func @transform_2(%arg0: i32) -> (i32, i32) {
    %c0_i32 = arith.constant 0 : i32
    %c0_i32_0 = arith.constant 0 : i32
    %c0_i32_1 = arith.constant 0 : i32
    return %c0_i32, %c0_i32_0 : i32, i32
  }
  func.func @transform_3(%arg0: i32) -> (i32, i32) {
    %c0_i32 = arith.constant 0 : i32
    %c0_i32_0 = arith.constant 0 : i32
    %c0_i32_1 = arith.constant 0 : i32
    return %c0_i32, %c0_i32_0 : i32, i32
  }
  func.func @transform_4(%arg0: i32) -> (i32, i32, i32) {
    %c0_i32 = arith.constant 0 : i32
    %c0_i32_0 = arith.constant 0 : i32
    %c0_i32_1 = arith.constant 0 : i32
    %c0_i32_2 = arith.constant 0 : i32
    return %c0_i32, %c0_i32_0, %c0_i32_1 : i32, i32, i32
  }
  func.func @transform_5(%arg0: i32) -> (i32, i32) {
    %c0_i32 = arith.constant 0 : i32
    %c0_i32_0 = arith.constant 0 : i32
    %c0_i32_1 = arith.constant 0 : i32
    return %c0_i32, %c0_i32_0 : i32, i32
  }
  func.func @transform_6(%arg0: i32) -> (i32, i32) {
    %c0_i32 = arith.constant 0 : i32
    %c0_i32_0 = arith.constant 0 : i32
    %c0_i32_1 = arith.constant 0 : i32
    return %c0_i32, %c0_i32_0 : i32, i32
  }
  func.func @transform_7(%arg0: i32) -> (i32, i32) {
    %c0_i32 = arith.constant 0 : i32
    %c0_i32_0 = arith.constant 0 : i32
    %c0_i32_1 = arith.constant 0 : i32
    return %c0_i32, %c0_i32_0 : i32, i32
  }
  func.func @transform_8(%arg0: i32) -> (i32, i32) {
    %c0_i32 = arith.constant 0 : i32
    %c0_i32_0 = arith.constant 0 : i32
    %c0_i32_1 = arith.constant 0 : i32
    return %c0_i32, %c0_i32_0 : i32, i32
  }
  func.func @transform_9(%arg0: i32) -> (i32, i32) {
    %c0_i32 = arith.constant 0 : i32
    %c0_i32_0 = arith.constant 0 : i32
    %c0_i32_1 = arith.constant 0 : i32
    return %c0_i32, %c0_i32_0 : i32, i32
  }
  func.func @transform_10(%arg0: i32) -> (i32, i32) {
    %c0_i32 = arith.constant 0 : i32
    %c0_i32_0 = arith.constant 0 : i32
    %c0_i32_1 = arith.constant 0 : i32
    return %c0_i32, %c0_i32_0 : i32, i32
  }
  func.func @transform_11(%arg0: i32) -> (i32, i32) {
    %c0_i32 = arith.constant 0 : i32
    %c0_i32_0 = arith.constant 0 : i32
    %c0_i32_1 = arith.constant 0 : i32
    return %c0_i32, %c0_i32_0 : i32, i32
  }
  func.func @transform_12(%arg0: i32) -> (i32, i32, i32) {
    %c0_i32 = arith.constant 0 : i32
    %c0_i32_0 = arith.constant 0 : i32
    %c0_i32_1 = arith.constant 0 : i32
    return %arg0, %c0_i32, %c0_i32_0 : i32, i32, i32
  }
}

</mosaic_0001>

<bundles_post_ra>
// kernel: tpu_custom_call.1
= control target key start
LH: loop header
LB: loop body
LE: loop exit
PB: predicated region body
PF: predicated region fallthrough
CT: control target
= control target key end

     0   :  { %s3837_s0 = inlined_call_operand.vmem [shape: f32[2,16,128], index: 0, kind: input, shape index: {}]   ;;  %s3838_s1 = inlined_call_operand.vmem [shape: f32[9,1,128], index: 1, kind: input, shape index: {}]   ;;  %s3839_s2 = inlined_call_operand.vmem [shape: bf16[64,16], index: 2, kind: input, shape index: {}]   ;;  %s3840_s3 = inlined_call_operand.vmem [shape: f32[64,1], index: 3, kind: input, shape index: {}]   ;;  %s3841_s4 = inlined_call_operand.vmem [shape: f32[9,64,1], index: 4, kind: input, shape index: {}]   ;;  %s3842_s5 = inlined_call_operand.vmem [shape: f32[64,1], index: 5, kind: input, shape index: {}]   ;;  %s3843_s6 = inlined_call_operand.vmem [shape: f32[4,64], index: 6, kind: input, shape index: {}]   ;;  %s3844_s7 = inlined_call_operand.vmem [shape: f32[4,1], index: 7, kind: input, shape index: {}]   ;;  %s3845_s8 = inlined_call_operand.vmem [shape: f32[64,4], index: 8, kind: input, shape index: {}]   ;;  %s3846_s9 = inlined_call_operand.vmem [shape: f32[64,1], index: 9, kind: input, shape index: {}]   ;;  %s3847_s10 = inlined_call_operand.vmem [shape: f32[16,64], index: 10, kind: input, shape index: {}]   ;;  %s3848_s11 = inlined_call_operand.vmem [shape: f32[16,1], index: 11, kind: input, shape index: {}]   ;;  %s3849_s12 = inlined_call_operand.hbm [shape: f32[2,16,128], index: 12, kind: output, shape index: {}]  }
   0x1   :  { %3854 = sst [smem:[#allocation44_spill]] %s3837_s0 }
   0x2   :  { %17 = vsyncpa [#allocation3], 0 }
   0x3   :  { %19 = vsyncpa [#allocation3 + $0x1], 0  ;;  %s2743_s21 = smov 0   ;;  %s2745_s22 = smov 0  }
   0x4   :  { %s2747_s23 = smov 0   ;;  %s2749_s24 = smov 0  }
   0x5 LB: > { %s2764_s25 = sadd.s32 4294967295, %s2661_s24   ;;  %s2148_s26 = sadd.s32 4294967294, %s2661_s24   ;;  %s2661_s24 = sphi %s2749_s24, %s3940_s24   ;;  %s2657_s23 = sphi %s2747_s23, %s3939_s23   ;;  %s2653_s22 = sphi %s2745_s22, %s3938_s22   ;;  %s2649_s21 = sphi %s2743_s21, %s3937_s21  }
   0x6   : > { %s2768_s27 = sadd.s32 1, %s2661_s24   ;;  %s289_s28 = sadd.s32 1, %s2657_s23 }
   0x7   : > { %s286_s29 = ssub.s32 %s2661_s24, %s2768_s27  ;;  %p299_p0 = scmp.ne.s32.totalorder %s2657_s23, %s2653_s22 }
   0x8   : > { %p287_p1 = scmp.eq.s32.totalorder %s286_s29, 0  ;;  %p300_p2 = scmp.eq.s32.totalorder %s2764_s25, 1 }
   0x9   : > { %p305_p3 = scmp.ne.s32.totalorder %s2653_s22, %s2649_s21  ;;  %p306_p4 = scmp.eq.s32.totalorder %s2148_s26, 1 }
   0xa   : > { %s2779_s30 = scalar_select %p287_p1, %s2657_s23, %s289_s28  }
   0xb   : > { %p2781_p5 = por %p300_p2, %p299_p0  ;;  %p2785_p6 = por %p306_p4, %p305_p3 }
   0xc   : > { %3855 = sst [smem:[#allocation5_spill]] %s2779_s30  ;;  %p2151_p7 = scmp.ge.s32.totalorder %s2661_s24, 1 }
   0xd   : > { %p365_p8 = scmp.lt.s32.totalorder %s2661_s24, 3 }
   0xf   : > { %p366_p9 = pnand %p2151_p7, %p365_p8 }
  0x11   : > { %369 = sbr.rel (%p366_p9) target bundleno = 1825 (0x721), region = 68 }
  0x18   : > { %v426_v0 = vld [vmem:[%s3840_s3 + $0x10] sm:$0xff]  ;;  %v424_v1 = vld [vmem:[%s3840_s3] sm:$0xff]  ;;  %p407_p10 = scmp.lt.s32.totalorder %s2764_s25, 1  ;;  %v2663_v2 = vmov 0   ;;  %v427_v3 = vld [vmem:[%s3840_s3 + $0x18] sm:$0xff]  ;;  %vm492_vm0 = vcmask 130048  }
  0x19   : > { %2472 = vset.pattern.permute.xlu1 %v2663_v2  ;;  %2471 = vset.pattern.permute.xlu0 %v2663_v2  ;;  %v2493_v4 = vld [vmem:[%s3839_s2] sm:$0xff]   ;;  %v425_v5 = vld [vmem:[%s3840_s3 + $0x8] sm:$0xff]  ;;  %s3858_s0 = sld [smem:[#allocation44_spill]]  ;;  %v431_v12 = vld [vmem:[%s3840_s3 + $0x38] sm:$0xff]  ;;  %s2664_s29 = smov 17   ;;  %vm2673_vm1 = vmmov 0  }
  0x1a   : > { %444 = vperm.xlu1 %2472, %v426_v0   ;;  %434 = vperm.xlu0 %2471, %v424_v1   ;;  %s408_s26 = scalar_select %p407_p10, %s2764_s25, 1  ;;  %v429_v8 = vld [vmem:[%s3840_s3 + $0x28] sm:$0xff]  ;;  %v428_v10 = vld [vmem:[%s3840_s3 + $0x20] sm:$0xff]  ;;  %v2495_v13 = vld [vmem:[%s3839_s2 + $0x10] sm:$0xff]   ;;  %vm1587_vm2 = vcmask 523264   ;;  %vm1683_vm3 = vcmask 31744  }
  0x1b   : > { %2310 = vmatprep.mubr.msk.bf16.mxu1 %vm492_vm0, %v2493_v4  ;;  %v2494_v11 = vld [vmem:[%s3839_s2 + $0x8] sm:$0xff]   ;;  %v430_v14 = vld [vmem:[%s3840_s3 + $0x30] sm:$0xff]  ;;  %v649_v16 = vld [vmem:[%s3841_s4] sm:$0xff]  ;;  %s2666_s30 = smov 15   ;;  %s2667_s15 = smov 1   ;;  %vm1708_vm4 = vcmask 1043456  }
  0x1c   : > { %s2268_s17 = sshll.u32 %s408_s26, 4  ;;  %v650_v15 = vld [vmem:[%s3841_s4 + $0x8] sm:$0xff]  ;;  %v2496_v17 = vld [vmem:[%s3839_s2 + $0x18] sm:$0xff]   ;;  %v2166_v19 = vld [vmem:[%s3841_s4 + $0x40] sm:$0xff]  ;;  %s2665_s26 = smov 16  }
  0x1d   : > { %v2167_v18 = vld [vmem:[%s3841_s4 + $0x48] sm:$0xff]  ;;  %v2176_v21 = vld [vmem:[%s3841_s4 + $0x80] sm:$0xff]  ;;  %v652_v22 = vld [vmem:[%s3841_s4 + $0x18] sm:$0xff]  ;;  %s2668_s16 = smov 127   ;;  %s2671_s18 = smov 111  }
  0x1e   : > { %449 = vperm.xlu1 %2472, %v427_v3   ;;  %439 = vperm.xlu0 %2471, %v425_v5   ;;  %v2177_v20 = vld [vmem:[%s3841_s4 + $0x88] sm:$0xff]  ;;  %v651_v23 = vld [vmem:[%s3841_s4 + $0x10] sm:$0xff]  ;;  %v2169_v24 = vld [vmem:[%s3841_s4 + $0x58] sm:$0xff]  ;;  %s2269_s28 = sshll.u32 %s2764_s25, 8 }
  0x1f   : > { %s2812_s19 = scalar_lea.vmem %s3858_s0, %s2268_s17  ;;  %v2168_v25 = vld [vmem:[%s3841_s4 + $0x50] sm:$0xff]  ;;  %v2187_v26 = vld [vmem:[%s3841_s4 + $0xc8] sm:$0xff]  ;;  %v2186_v27 = vld [vmem:[%s3841_s4 + $0xc0] sm:$0xff]  ;;  %s2669_s17 = smov 113  }
  0x20   : > { %v413_v6 = vld [vmem:[%s2812_s19] sm:$0xff]  ;;  %v414_v7 = vld [vmem:[%s2812_s19 + $0x8] sm:$0xff]  ;;  %v2179_v28 = vld [vmem:[%s3841_s4 + $0x98] sm:$0xff]  ;;  %s3850_s0 = smov 112  }
  0x21   : > { %v423_v9 = vpack.c.bf16 %v414_v7, %v413_v6  ;;  %v2178_v29 = vld [vmem:[%s3841_s4 + $0x90] sm:$0xff]  ;;  %v2195_v30 = vld [vmem:[%s3841_s4 + $0x108] sm:$0xff]  ;;  %v2194_v31 = vld [vmem:[%s3841_s4 + $0x100] sm:$0xff] }
  0x22   : > { %459 = vperm.xlu1 %2472, %v429_v8   ;;  %454 = vperm.xlu0 %2471, %v428_v10   ;;  %v654_v32 = vld [vmem:[%s3841_s4 + $0x28] sm:$0xff]  ;;  %v653_v33 = vld [vmem:[%s3841_s4 + $0x20] sm:$0xff]  ;;  %v2189_v36 = vld [vmem:[%s3841_s4 + $0xd8] sm:$0xff] }
  0x23   : > { %2308 = vmatprep.subr.bf16.mxu1 %v423_v9  ;;  %v2171_v34 = vld [vmem:[%s3841_s4 + $0x68] sm:$0xff]  ;;  %v2170_v35 = vld [vmem:[%s3841_s4 + $0x60] sm:$0xff]  ;;  %v2188_v37 = vld [vmem:[%s3841_s4 + $0xd0] sm:$0xff] }
  0x24   : > { %2309 = vmatpush3.bf16.msra.mxu1 %v423_v9  ;;  %v2205_v38 = vld [vmem:[%s3841_s4 + $0x148] sm:$0xff]  ;;  %v2204_v39 = vld [vmem:[%s3841_s4 + $0x140] sm:$0xff]  ;;  %v2197_v42 = vld [vmem:[%s3841_s4 + $0x118] sm:$0xff] }
  0x25   : > { %v2181_v40 = vld [vmem:[%s3841_s4 + $0xa8] sm:$0xff]  ;;  %v2180_v41 = vld [vmem:[%s3841_s4 + $0xa0] sm:$0xff]  ;;  %v2196_v43 = vld [vmem:[%s3841_s4 + $0x110] sm:$0xff] }
  0x26   : > { %469 = vperm.xlu1 %2472, %v431_v12   ;;  %464 = vperm.xlu0 %2471, %v430_v14   ;;  %v2215_v44 = vld [vmem:[%s3841_s4 + $0x188] sm:$0xff]  ;;  %v2214_v45 = vld [vmem:[%s3841_s4 + $0x180] sm:$0xff]  ;;  %v656_v46 = vld [vmem:[%s3841_s4 + $0x38] sm:$0xff] }
  0x27   : > { %2311 = vmatmul.mubr.msk.bf16.vlgmr.msra.gmra.mrb[0].mxu1 %vm492_vm0, %v2494_v11  ;;  %v655_v47 = vld [vmem:[%s3841_s4 + $0x30] sm:$0xff]  ;;  %v2173_v48 = vld [vmem:[%s3841_s4 + $0x78] sm:$0xff]  ;;  %v2191_v50 = vld [vmem:[%s3841_s4 + $0xe8] sm:$0xff] }
  0x28   : > { %2314 = vmatprep.mubr.msk.bf16.mxu1 %vm492_vm0, %v2495_v13  ;;  %v2172_v49 = vld [vmem:[%s3841_s4 + $0x70] sm:$0xff]  ;;  %v2190_v51 = vld [vmem:[%s3841_s4 + $0xe0] sm:$0xff]  ;;  %v2207_v52 = vld [vmem:[%s3841_s4 + $0x158] sm:$0xff] }
  0x29   : > { %v2206_v53 = vld [vmem:[%s3841_s4 + $0x150] sm:$0xff]  ;;  %v2225_v54 = vld [vmem:[%s3841_s4 + $0x1c8] sm:$0xff]  ;;  %v2224_v55 = vld [vmem:[%s3841_s4 + $0x1c0] sm:$0xff] }
  0x2a   : > { %664 = vperm.xlu1 %2472, %v650_v15   ;;  %659 = vperm.xlu0 %2471, %v649_v16   ;;  %v2183_v56 = vld [vmem:[%s3841_s4 + $0xb8] sm:$0xff]  ;;  %v2182_v57 = vld [vmem:[%s3841_s4 + $0xb0] sm:$0xff]  ;;  %v2199_v58 = vld [vmem:[%s3841_s4 + $0x128] sm:$0xff] }
  0x2b   : > { %v2198_v59 = vld [vmem:[%s3841_s4 + $0x120] sm:$0xff]  ;;  %v2217_v60 = vld [vmem:[%s3841_s4 + $0x198] sm:$0xff]  ;;  %v2216_v61 = vld [vmem:[%s3841_s4 + $0x190] sm:$0xff] }
  0x2c   : > { %v2235_v62 = vld [vmem:[%s3841_s4 + $0x208] sm:$0xff]  ;;  %v2234_v63 = vld [vmem:[%s3841_s4 + $0x200] sm:$0xff]  ;;  %v2193_v0 = vld [vmem:[%s3841_s4 + $0xf8] sm:$0xff] }
  0x2d   : > { %v2192_v1 = vld [vmem:[%s3841_s4 + $0xf0] sm:$0xff]  ;;  %v2209_v2 = vld [vmem:[%s3841_s4 + $0x168] sm:$0xff]  ;;  %v2208_v3 = vld [vmem:[%s3841_s4 + $0x160] sm:$0xff] }
  0x2e   : > { %761 = vperm.xlu1 %2472, %v2167_v18   ;;  %756 = vperm.xlu0 %2471, %v2166_v19   ;;  %v2227_v4 = vld [vmem:[%s3841_s4 + $0x1d8] sm:$0xff]  ;;  %v2226_v5 = vld [vmem:[%s3841_s4 + $0x1d0] sm:$0xff]  ;;  %v2219_v8 = vld [vmem:[%s3841_s4 + $0x1a8] sm:$0xff] }
  0x2f   : > { %2315 = vmatmul.mubr.msk.bf16.gmra.mrb[4].mxu1 %vm492_vm0, %v2496_v17  ;;  %v2201_v6 = vld [vmem:[%s3841_s4 + $0x138] sm:$0xff]  ;;  %v2200_v7 = vld [vmem:[%s3841_s4 + $0x130] sm:$0xff]  ;;  %v2218_v9 = vld [vmem:[%s3841_s4 + $0x1a0] sm:$0xff] }
  0x30   : > { %v2237_v12 = vld [vmem:[%s3841_s4 + $0x218] sm:$0xff]  ;;  %v2236_v13 = vld [vmem:[%s3841_s4 + $0x210] sm:$0xff]  ;;  %v1458_v15 = vld [vmem:[%s3842_s5 + $0x8] sm:$0xff] }
  0x31   : > { %v1457_v17 = vld [vmem:[%s3842_s5] sm:$0xff]  ;;  %v2211_v18 = vld [vmem:[%s3841_s4 + $0x178] sm:$0xff] }
  0x32   : > { %858 = vperm.xlu1 %2472, %v2177_v20   ;;  %853 = vperm.xlu0 %2471, %v2176_v21   ;;  %v2210_v20 = vld [vmem:[%s3841_s4 + $0x170] sm:$0xff] }
  0x36   : > { %674 = vperm.xlu1 %2472, %v652_v22   ;;  %669 = vperm.xlu0 %2471, %v651_v23   ;;  %v2229_v22 = vld [vmem:[%s3841_s4 + $0x1e8] sm:$0xff]  ;;  %v2228_v23 = vld [vmem:[%s3841_s4 + $0x1e0] sm:$0xff] }
  0x3a   : > { %771 = vperm.xlu1 %2472, %v2169_v24   ;;  %766 = vperm.xlu0 %2471, %v2168_v25   ;;  %v2221_v25 = vld [vmem:[%s3841_s4 + $0x1b8] sm:$0xff] }
  0x3e   : > { %955 = vperm.xlu1 %2472, %v2187_v26   ;;  %950 = vperm.xlu0 %2471, %v2186_v27   ;;  %v2220_v27 = vld [vmem:[%s3841_s4 + $0x1b0] sm:$0xff] }
  0x42   : > { %868 = vperm.xlu1 %2472, %v2179_v28   ;;  %863 = vperm.xlu0 %2471, %v2178_v29   ;;  %v2239_v28 = vld [vmem:[%s3841_s4 + $0x228] sm:$0xff] }
  0x46   : > { %1020 = vperm.xlu1 %2472, %v2195_v30   ;;  %1015 = vperm.xlu0 %2471, %v2194_v31   ;;  %v2238_v30 = vld [vmem:[%s3841_s4 + $0x220] sm:$0xff] }
  0x4a   : > { %684 = vperm.xlu1 %2472, %v654_v32   ;;  %679 = vperm.xlu0 %2471, %v653_v33   ;;  %v1460_v32 = vld [vmem:[%s3842_s5 + $0x18] sm:$0xff]  ;;  %v1459_v33 = vld [vmem:[%s3842_s5 + $0x10] sm:$0xff] }
  0x4e   : > { %781 = vperm.xlu1 %2472, %v2171_v34   ;;  %776 = vperm.xlu0 %2471, %v2170_v35   ;;  %v2231_v35 = vld [vmem:[%s3841_s4 + $0x1f8] sm:$0xff] }
  0x52   : > { %965 = vperm.xlu1 %2472, %v2189_v36   ;;  %960 = vperm.xlu0 %2471, %v2188_v37   ;;  %v2230_v37 = vld [vmem:[%s3841_s4 + $0x1f0] sm:$0xff] }
  0x56   : > { %1117 = vperm.xlu1 %2472, %v2205_v38   ;;  %1112 = vperm.xlu0 %2471, %v2204_v39  }
  0x5a   : > { %878 = vperm.xlu1 %2472, %v2181_v40   ;;  %873 = vperm.xlu0 %2471, %v2180_v41  }
  0x5e   : > { %1030 = vperm.xlu1 %2472, %v2197_v42   ;;  %1025 = vperm.xlu0 %2471, %v2196_v43  }
  0x62   : > { %1214 = vperm.xlu1 %2472, %v2215_v44   ;;  %1209 = vperm.xlu0 %2471, %v2214_v45  }
  0x66   : > { %694 = vperm.xlu1 %2472, %v656_v46   ;;  %689 = vperm.xlu0 %2471, %v655_v47  }
  0x6a   : > { %791 = vperm.xlu1 %2472, %v2173_v48   ;;  %786 = vperm.xlu0 %2471, %v2172_v49  }
  0x6e   : > { %975 = vperm.xlu1 %2472, %v2191_v50   ;;  %970 = vperm.xlu0 %2471, %v2190_v51  }
  0x72   : > { %1127 = vperm.xlu1 %2472, %v2207_v52   ;;  %1122 = vperm.xlu0 %2471, %v2206_v53  }
  0x76   : > { %1311 = vperm.xlu1 %2472, %v2225_v54   ;;  %1306 = vperm.xlu0 %2471, %v2224_v55  }
  0x7a   : > { %888 = vperm.xlu1 %2472, %v2183_v56   ;;  %883 = vperm.xlu0 %2471, %v2182_v57  }
  0x7e   : > { %1040 = vperm.xlu1 %2472, %v2199_v58   ;;  %1035 = vperm.xlu0 %2471, %v2198_v59  }
  0x82   : > { %1224 = vperm.xlu1 %2472, %v2217_v60   ;;  %1219 = vperm.xlu0 %2471, %v2216_v61  }
  0x86   : > { %1408 = vperm.xlu1 %2472, %v2235_v62   ;;  %1403 = vperm.xlu0 %2471, %v2234_v63  }
  0x8a   : > { %985 = vperm.xlu1 %2472, %v2193_v0   ;;  %980 = vperm.xlu0 %2471, %v2192_v1  }
  0x8e   : > { %1137 = vperm.xlu1 %2472, %v2209_v2   ;;  %1132 = vperm.xlu0 %2471, %v2208_v3  }
  0x92   : > { %1321 = vperm.xlu1 %2472, %v2227_v4   ;;  %1316 = vperm.xlu0 %2471, %v2226_v5  }
  0x96   : > { %1050 = vperm.xlu1 %2472, %v2201_v6   ;;  %1045 = vperm.xlu0 %2471, %v2200_v7  }
  0x99   : > { %v3014_v10 = vpop.permute.xlu0 %434  ;;  %v3016_v11 = vpop.permute.xlu1 %444 }
  0x9a   : > { %1234 = vperm.xlu1 %2472, %v2219_v8   ;;  %1229 = vperm.xlu0 %2471, %v2218_v9  }
  0x9d   : > { %v3024_v14 = vpop.permute.xlu0 %439  ;;  %v3029_v16 = vpop.permute.xlu1 %449 }
  0x9e   : > { %1418 = vperm.xlu1 %2472, %v2237_v12   ;;  %1413 = vperm.xlu0 %2471, %v2236_v13  }
  0xa1   : > { %v3037_v19 = vpop.permute.xlu0 %454  ;;  %v3042_v21 = vpop.permute.xlu1 %459 }
  0xa2   : > { %1472 = vperm.xlu1 %2472, %v1458_v15   ;;  %1467 = vperm.xlu0 %2471, %v1457_v17  }
  0xa5   : > { %v3050_v24 = vpop.permute.xlu0 %464  ;;  %v3055_v26 = vpop.permute.xlu1 %469 }
  0xa6   : > { %1147 = vperm.xlu1 %2472, %v2211_v18   ;;  %1142 = vperm.xlu0 %2471, %v2210_v20  }
  0xa9   : > { %v3063_v29 = vpop.permute.xlu0 %659  ;;  %v3068_v31 = vpop.permute.xlu1 %664 }
  0xaa   : > { %1331 = vperm.xlu1 %2472, %v2229_v22   ;;  %1326 = vperm.xlu0 %2471, %v2228_v23  }
  0xad   : > { %v3076_v34 = vpop.permute.xlu0 %756  ;;  %v3081_v36 = vpop.permute.xlu1 %761 }
  0xae   : > { %1244 = vperm.xlu1 %2472, %v2221_v25   ;;  %1239 = vperm.xlu0 %2471, %v2220_v27  }
  0xb1   : > { %v3086_v38 = vpop.permute.xlu0 %853  ;;  %v3088_v39 = vpop.permute.xlu1 %858 }
  0xb2   : > { %1428 = vperm.xlu1 %2472, %v2239_v28   ;;  %1423 = vperm.xlu0 %2471, %v2238_v30  }
  0xb5   : > { %v3090_v40 = vpop.permute.xlu0 %669  ;;  %v3092_v41 = vpop.permute.xlu1 %674 }
  0xb6   : > { %1482 = vperm.xlu1 %2472, %v1460_v32   ;;  %1477 = vperm.xlu0 %2471, %v1459_v33  }
  0xb9   : > { %v3094_v42 = vpop.permute.xlu0 %766  ;;  %v3096_v43 = vpop.permute.xlu1 %771 }
  0xba   : > { %1341 = vperm.xlu1 %2472, %v2231_v35   ;;  %1336 = vperm.xlu0 %2471, %v2230_v37  }
  0xbd   : > { %v3098_v44 = vpop.permute.xlu0 %950  ;;  %v3100_v45 = vpop.permute.xlu1 %955 }
  0xc1   : > { %v3102_v46 = vpop.permute.xlu0 %863  ;;  %v3104_v47 = vpop.permute.xlu1 %868 }
  0xc5   : > { %v3106_v48 = vpop.permute.xlu0 %1015  ;;  %v3108_v49 = vpop.permute.xlu1 %1020 }
  0xc9   : > { %v3110_v50 = vpop.permute.xlu0 %679  ;;  %v3112_v51 = vpop.permute.xlu1 %684 }
  0xca   : > { %3859 = vst [vmem:[#allocation6_spill] sm:$0xff] %v3110_v50  ;;  %3860 = vst [vmem:[#allocation7_spill] sm:$0xff] %v3112_v51 }
  0xcd   : > { %v3114_v52 = vpop.permute.xlu0 %776  ;;  %v3116_v53 = vpop.permute.xlu1 %781 }
  0xce   : > { %3861 = vst [vmem:[#allocation8_spill] sm:$0xff] %v3114_v52  ;;  %3862 = vst [vmem:[#allocation9_spill] sm:$0xff] %v3116_v53 }
  0xd1   : > { %v3118_v54 = vpop.permute.xlu0 %960  ;;  %v3120_v55 = vpop.permute.xlu1 %965 }
  0xd5   : > { %v3122_v56 = vpop.permute.xlu0 %1112  ;;  %v3124_v57 = vpop.permute.xlu1 %1117 }
  0xd9   : > { %v3126_v58 = vpop.permute.xlu0 %873  ;;  %v3128_v60 = vpop.permute.xlu1 %878 }
  0xda   : > { %3863 = vst [vmem:[#allocation10_spill] sm:$0xff] %v3126_v58  ;;  %3864 = vst [vmem:[#allocation11_spill] sm:$0xff] %v3128_v60 }
  0xdd   : > { %v3132_v3 = vpop.permute.xlu0 %1025  ;;  %v3134_v6 = vpop.permute.xlu1 %1030 }
  0xe1   : > { %v3142_v15 = vpop.permute.xlu1 %1214 }
  0xe5   : > { %v3146_v22 = vpop.permute.xlu1 %694 }
  0xe6   : > { %3866 = vst [vmem:[#allocation13_spill] sm:$0xff] %v3146_v22 }
  0xe9   : > { %v3156_v30 = vpop.permute.xlu1 %791 }
  0xea   : > { %3868 = vst [vmem:[#allocation15_spill] sm:$0xff] %v3156_v30 }
  0xfa   : > { %v2312_v59 = vpop.f32.mrb[0].mxu1 }
  0xfb   : > { %v548_v61 = vadd.f32 %v2312_v59, %v3016_v11  ;;  %v539_v62 = vpop.f32.mrb[1].mxu1  ;;  %v3138_v11 = vpop.permute.xlu0 %1209 }
  0xfc   : > { %v2313_v63 = vpop.f32.mrb[2].mxu1  ;;  %v3149_v25 = vadd.f32 %v539_v62, %v3014_v10 }
  0xfd   : > { %v572_v0 = vsub.f32 0.0, %v548_v61  ;;  %v551_v1 = vadd.f32 %v2313_v63, %v3029_v16  ;;  %v542_v2 = vpop.f32.mrb[3].mxu1  ;;  %v3162_v63 = vpop.permute.xlu1 %975 }
  0xfe   : > { %v3154_v28 = vadd.f32 %v542_v2, %v3024_v14  ;;  %v570_v32 = vsub.f32 0.0, %v3149_v25  ;;  %3870 = vst [vmem:[#allocation17_spill] sm:$0xff] %v3162_v63 }
  0xff   : > { %v582_v4 = vmul.f32 1.442695, %v572_v0  ;;  %v573_v5 = vsub.f32 0.0, %v551_v1  ;;  %v3144_v17 = vpop.permute.xlu0 %689 }
 0x100   : > { %3865 = vst [vmem:[#allocation12_spill] sm:$0xff] %v3144_v17  ;;  %v571_v33 = vsub.f32 0.0, %v3154_v28  ;;  %v578_v37 = vmul.f32 1.442695, %v570_v32 }
 0x101   : > { %2497 = vpow2.f32 %v582_v4  ;;  %v584_v7 = vmul.f32 1.442695, %v573_v5  ;;  %v3174_v2 = vpop.permute.xlu1 %1127 }
 0x102   : > { %v2316_v8 = vpop.f32.mrb[4].mxu1  ;;  %v580_v62 = vmul.f32 1.442695, %v571_v33 }
 0x103   : > { %2499 = vpow2.f32 %v584_v7  ;;  %v3136_v9 = vpop.f32.mrb[5].mxu1  ;;  %v3151_v27 = vpop.permute.xlu0 %786  ;;  %v3203_v33 = vadd.f32 %v2316_v8, %v3050_v24 }
 0x104   : > { %v2317_v12 = vpop.f32.mrb[6].mxu1  ;;  %3867 = vst [vmem:[#allocation14_spill] sm:$0xff] %v3151_v27  ;;  %v1461_v27 = vld [vmem:[%s3842_s5 + $0x20] sm:$0xff] }
 0x105   : > { %v3140_v13 = vpop.f32.mrb[7].mxu1  ;;  %v3184_v5 = vpop.permute.xlu1 %1311 }
 0x107   : > { %v3160_v35 = vpop.permute.xlu0 %970 }
 0x108   : > { %3869 = vst [vmem:[#allocation16_spill] sm:$0xff] %v3160_v35 }
 0x10b   : > { %v2498_v16 = vpop.eup %2497  ;;  %v3170_v14 = vpop.permute.xlu0 %1122 }
 0x10c   : > { %v596_v18 = vadd.f32 1.0, %v2498_v16 }
 0x10d   : > { %v2500_v20 = vpop.eup %2499 }
 0x10e   : > { %2501 = vrcp.f32 %v596_v18  ;;  %v597_v23 = vadd.f32 1.0, %v2500_v20 }
 0x110   : > { %2503 = vrcp.f32 %v597_v23  ;;  %v3194_v23 = vpop.permute.xlu1 %888 }
 0x111   : > { %2505 = vpow2.f32 %v578_v37  ;;  %3872 = vst [vmem:[#allocation19_spill] sm:$0xff] %v3194_v23 }
 0x112   : > { %2507 = vpow2.f32 %v580_v62  ;;  %v576_v62 = vsub.f32 0.0, %v3203_v33 }
 0x114   : > { %v3207_v37 = vpop.permute.xlu1 %1040 }
 0x115   : > { %3874 = vst [vmem:[#allocation21_spill] sm:$0xff] %v3207_v37 }
 0x118   : > { %v2502_v59 = vpop.eup %2501 }
 0x119   : > { %v3164_v10 = vmul.f32 %v2502_v59, %v548_v61  ;;  %v3180_v61 = vpop.permute.xlu0 %1306  ;;  %v3210_v59 = vadd.f32 %v2317_v12, %v3055_v26  ;;  %v3222_v26 = vpop.permute.xlu1 %1224 }
 0x11a   : > { %v2504_v0 = vpop.eup %2503 }
 0x11b   : > { %v3166_v4 = vmul.f32 %v2504_v0, %v551_v1  ;;  %622 = vrot.lane.b32.xlu0 %v3164_v10, %s2664_s29  ;;  %v2506_v1 = vpop.eup %2505  ;;  %v577_v8 = vsub.f32 0.0, %v3210_v59 }
 0x11c   : > { %v2508_v7 = vpop.eup %2507  ;;  %v594_v16 = vadd.f32 1.0, %v2506_v1  ;;  %v590_v1 = vmul.f32 1.442695, %v576_v62 }
 0x11d   : > { %624 = vrot.lane.b32.xlu1 %v3166_v4, %s2664_s29  ;;  %v3190_v18 = vpop.permute.xlu0 %883  ;;  %v595_v20 = vadd.f32 1.0, %v2508_v7  ;;  %v3238_v62 = vpop.permute.xlu1 %1408 }
 0x11e   : > { %3871 = vst [vmem:[#allocation18_spill] sm:$0xff] %v3190_v18  ;;  %2509 = vrcp.f32 %v594_v16  ;;  %v592_v16 = vmul.f32 1.442695, %v577_v8 }
 0x11f   : > { %717 = vrot.lane.b32.xlu0 %v3164_v10, %s2665_s26  ;;  %2511 = vrcp.f32 %v595_v20 }
 0x120   : > { %2513 = vpow2.f32 %v590_v1 }
 0x121   : > { %719 = vrot.lane.b32.xlu1 %v3166_v4, %s2665_s26  ;;  %v3200_v32 = vpop.permute.xlu0 %1035  ;;  %2515 = vpow2.f32 %v592_v16 }
 0x122   : > { %3873 = vst [vmem:[#allocation20_spill] sm:$0xff] %v3200_v32  ;;  %v3399_v32 = vld [vmem:[%s3838_s1 + $0x1] ss:$0 sm:$0xff] }
 0x123   : > { %814 = vrot.lane.b32.xlu0 %v3164_v10, %s2666_s30 }
 0x125   : > { %816 = vrot.lane.b32.xlu1 %v3166_v4, %s2666_s30  ;;  %v3217_v24 = vpop.permute.xlu0 %1219 }
 0x127   : > { %911 = vrot.lane.b32.xlu0 %v3164_v10, %s2667_s15 }
 0x128   : > { %v2510_v0 = vpop.eup %2509 }
 0x129   : > { %913 = vrot.lane.b32.xlu1 %v3166_v4, %s2667_s15  ;;  %v2512_v12 = vpop.eup %2511  ;;  %v3227_v7 = vmul.f32 %v2510_v0, %v3149_v25  ;;  %v3234_v23 = vpop.permute.xlu0 %1403  ;;  %v556_v25 = vadd.f32 %v3136_v9, %v3037_v19 }
 0x12a   : > { %v3232_v20 = vmul.f32 %v2512_v12, %v3154_v28  ;;  %v3250_v0 = vpop.permute.xlu1 %985  ;;  %v2514_v1 = vpop.eup %2513  ;;  %v559_v12 = vadd.f32 %v3140_v13, %v3042_v21 }
 0x12b   : > { %1073 = vrot.lane.b32.xlu0 %v3164_v10, %s2668_s16  ;;  %v574_v8 = vsub.f32 0.0, %v556_v25  ;;  %3876 = vst [vmem:[#allocation23_spill] sm:$0xff] %v3250_v0  ;;  %v2516_v19 = vpop.eup %2515 }
 0x12c   : > { %v575_v18 = vsub.f32 0.0, %v559_v12  ;;  %v601_v22 = vadd.f32 1.0, %v2516_v19 }
 0x12d   : > { %1075 = vrot.lane.b32.xlu1 %v3166_v4, %s2668_s16  ;;  %v3246_v28 = vpop.permute.xlu0 %980  ;;  %v586_v9 = vmul.f32 1.442695, %v574_v8 }
 0x12e   : > { %3875 = vst [vmem:[#allocation22_spill] sm:$0xff] %v3246_v28  ;;  %v600_v28 = vadd.f32 1.0, %v2514_v1  ;;  %v3262_v0 = vpop.permute.xlu1 %1137  ;;  %v588_v21 = vmul.f32 1.442695, %v575_v18 }
 0x12f   : > { %1170 = vrot.lane.b32.xlu0 %v3164_v10, %s2669_s17  ;;  %3878 = vst [vmem:[#allocation25_spill] sm:$0xff] %v3262_v0  ;;  %2517 = vpow2.f32 %v586_v9 }
 0x130   : > { %2519 = vrcp.f32 %v600_v28 }
 0x131   : > { %1172 = vrot.lane.b32.xlu1 %v3166_v4, %s2669_s17  ;;  %v3258_v16 = vpop.permute.xlu0 %1132  ;;  %2521 = vrcp.f32 %v601_v22 }
 0x132   : > { %3877 = vst [vmem:[#allocation24_spill] sm:$0xff] %v3258_v16  ;;  %v3272_v8 = vpop.permute.xlu1 %1321  ;;  %2523 = vpow2.f32 %v588_v21 }
 0x133   : > { %1267 = vrot.lane.b32.xlu0 %v3164_v10, %s3850_s0 }
 0x135   : > { %1269 = vrot.lane.b32.xlu1 %v3166_v4, %s3850_s0  ;;  %v3268_v13 = vpop.permute.xlu0 %1316 }
 0x136   : > { %v3282_v28 = vpop.permute.xlu1 %1050 }
 0x137   : > { %1364 = vrot.lane.b32.xlu0 %v3164_v10, %s2671_s18  ;;  %3880 = vst [vmem:[#allocation27_spill] sm:$0xff] %v3282_v28 }
 0x139   : > { %1366 = vrot.lane.b32.xlu1 %v3166_v4, %s2671_s18  ;;  %v3278_v1 = vpop.permute.xlu0 %1045  ;;  %v2518_v18 = vpop.eup %2517 }
 0x13a   : > { %3879 = vst [vmem:[#allocation26_spill] sm:$0xff] %v3278_v1  ;;  %v2520_v22 = vpop.eup %2519  ;;  %v598_v9 = vadd.f32 1.0, %v2518_v18  ;;  %v3298_v0 = vpop.permute.xlu1 %1234 }
 0x13b   : > { %618 = vrot.lane.b32.xlu0 %v3227_v7, %s2664_s29  ;;  %v2522_v19 = vpop.eup %2521  ;;  %v3289_v21 = vmul.f32 %v2520_v22, %v3203_v33  ;;  %3882 = vst [vmem:[#allocation29_spill] sm:$0xff] %v3298_v0 }
 0x13c   : > { %v2524_v1 = vpop.eup %2523  ;;  %v3296_v28 = vmul.f32 %v2522_v19, %v3210_v59  ;;  %2525 = vrcp.f32 %v598_v9 }
 0x13d   : > { %620 = vrot.lane.b32.xlu1 %v3232_v20, %s2664_s29  ;;  %v3291_v17 = vpop.permute.xlu0 %1229  ;;  %v599_v33 = vadd.f32 1.0, %v2524_v1 }
 0x13e   : > { %3881 = vst [vmem:[#allocation28_spill] sm:$0xff] %v3291_v17  ;;  %v3308_v22 = vpop.permute.xlu1 %1418 }
 0x13f   : > { %713 = vrot.lane.b32.xlu0 %v3227_v7, %s2665_s26  ;;  %2527 = vrcp.f32 %v599_v33 }
 0x141   : > { %715 = vrot.lane.b32.xlu1 %v3232_v20, %s2665_s26  ;;  %v3304_v18 = vpop.permute.xlu0 %1413 }
 0x142   : > { %v3318_v19 = vpop.permute.xlu1 %1472 }
 0x143   : > { %810 = vrot.lane.b32.xlu0 %v3227_v7, %s2666_s30  ;;  %3884 = vst [vmem:[#allocation31_spill] sm:$0xff] %v3318_v19 }
 0x145   : > { %812 = vrot.lane.b32.xlu1 %v3232_v20, %s2666_s30  ;;  %v3314_v59 = vpop.permute.xlu0 %1467 }
 0x146   : > { %3883 = vst [vmem:[#allocation30_spill] sm:$0xff] %v3314_v59  ;;  %v2526_v1 = vpop.eup %2525  ;;  %v3330_v17 = vpop.permute.xlu1 %1147 }
 0x147   : > { %907 = vrot.lane.b32.xlu0 %v3227_v7, %s2667_s15  ;;  %v3322_v9 = vmul.f32 %v2526_v1, %v556_v25  ;;  %3887 = vst [vmem:[#allocation34_spill] sm:$0xff] %v3330_v17 }
 0x149   : > { %909 = vrot.lane.b32.xlu1 %v3232_v20, %s2667_s15  ;;  %3885 = vst [vmem:[#allocation32_spill] sm:$0xff] %v3322_v9  ;;  %v3326_v33 = vpop.permute.xlu0 %1142  ;;  %v2528_v0 = vpop.eup %2527 }
 0x14a   : > { %3886 = vst [vmem:[#allocation33_spill] sm:$0xff] %v3326_v33  ;;  %v3334_v30 = vmul.f32 %v2528_v0, %v559_v12  ;;  %v3342_v1 = vpop.permute.xlu1 %1331 }
 0x14b   : > { %1069 = vrot.lane.b32.xlu0 %v3227_v7, %s2668_s16  ;;  %3890 = vst [vmem:[#allocation37_spill] sm:$0xff] %v3342_v1  ;;  %v2241_v1 = vld [vmem:[%s3841_s4 + $0x238] sm:$0xff] }
 0x14c   : > { %3888 = vst [vmem:[#allocation35_spill] sm:$0xff] %v3334_v30 }
 0x14d   : > { %1071 = vrot.lane.b32.xlu1 %v3232_v20, %s2668_s16  ;;  %v3338_v25 = vpop.permute.xlu0 %1326 }
 0x14e   : > { %3889 = vst [vmem:[#allocation36_spill] sm:$0xff] %v3338_v25  ;;  %v3352_v0 = vpop.permute.xlu1 %1244 }
 0x14f   : > { %1166 = vrot.lane.b32.xlu0 %v3227_v7, %s2669_s17  ;;  %3892 = vst [vmem:[#allocation39_spill] sm:$0xff] %v3352_v0 }
 0x151   : > { %1168 = vrot.lane.b32.xlu1 %v3232_v20, %s2669_s17  ;;  %v3348_v17 = vpop.permute.xlu0 %1239 }
 0x152   : > { %3891 = vst [vmem:[#allocation38_spill] sm:$0xff] %v3348_v17  ;;  %v3362_v33 = vpop.permute.xlu1 %1428 }
 0x153   : > { %1263 = vrot.lane.b32.xlu0 %v3227_v7, %s3850_s0  ;;  %3894 = vst [vmem:[#allocation41_spill] sm:$0xff] %v3362_v33  ;;  %v2240_v33 = vld [vmem:[%s3841_s4 + $0x230] sm:$0xff] }
 0x155   : > { %1265 = vrot.lane.b32.xlu1 %v3232_v20, %s3850_s0  ;;  %v3358_v12 = vpop.permute.xlu0 %1423 }
 0x156   : > { %3893 = vst [vmem:[#allocation40_spill] sm:$0xff] %v3358_v12  ;;  %v3372_v17 = vpop.permute.xlu1 %1482 }
 0x157   : > { %1360 = vrot.lane.b32.xlu0 %v3227_v7, %s2671_s18 }
 0x159   : > { %1362 = vrot.lane.b32.xlu1 %v3232_v20, %s2671_s18  ;;  %v3368_v0 = vpop.permute.xlu0 %1477 }
 0x15a   : > { %v3388_v25 = vpop.permute.xlu1 %1341 }
 0x15b   : > { %630 = vrot.lane.b32.xlu0 %v3289_v21, %s2664_s29  ;;  %3896 = vst [vmem:[#allocation43_spill] sm:$0xff] %v3388_v25 }
 0x15d   : > { %632 = vrot.lane.b32.xlu1 %v3296_v28, %s2664_s29  ;;  %v3381_v12 = vpop.permute.xlu0 %1336 }
 0x15e   : > { %3895 = vst [vmem:[#allocation42_spill] sm:$0xff] %v3381_v12  ;;  %v1462_v12 = vld [vmem:[%s3842_s5 + $0x28] sm:$0xff] }
 0x15f   : > { %725 = vrot.lane.b32.xlu0 %v3289_v21, %s2665_s26 }
 0x161   : > { %727 = vrot.lane.b32.xlu1 %v3296_v28, %s2665_s26 }
 0x163   : > { %822 = vrot.lane.b32.xlu0 %v3289_v21, %s2666_s30 }
 0x165   : > { %824 = vrot.lane.b32.xlu1 %v3296_v28, %s2666_s30 }
 0x167   : > { %919 = vrot.lane.b32.xlu0 %v3289_v21, %s2667_s15 }
 0x169   : > { %921 = vrot.lane.b32.xlu1 %v3296_v28, %s2667_s15 }
 0x16b   : > { %626 = vrot.lane.b32.xlu0 %v3322_v9, %s2664_s29 }
 0x16d   : > { %1083 = vrot.lane.b32.xlu1 %v3296_v28, %s2668_s16 }
 0x16f   : > { %721 = vrot.lane.b32.xlu0 %v3322_v9, %s2665_s26 }
 0x171   : > { %628 = vrot.lane.b32.xlu1 %v3334_v30, %s2664_s29 }
 0x173   : > { %818 = vrot.lane.b32.xlu0 %v3322_v9, %s2666_s30 }
 0x175   : > { %723 = vrot.lane.b32.xlu1 %v3334_v30, %s2665_s26  ;;  %s3793_s26 = scalar_lea.hbm %s3849_s12, %s2269_s28 }
 0x177   : > { %915 = vrot.lane.b32.xlu0 %v3322_v9, %s2667_s15 }
 0x179   : > { %820 = vrot.lane.b32.xlu1 %v3334_v30, %s2666_s30 }
 0x17b   : > { %1077 = vrot.lane.b32.xlu0 %v3322_v9, %s2668_s16 }
 0x17d   : > { %917 = vrot.lane.b32.xlu1 %v3334_v30, %s2667_s15  ;;  %s2675_s15 = smov [#allocation2]  }
 0x17f   : > { %1174 = vrot.lane.b32.xlu0 %v3322_v9, %s2669_s17 }
 0x181   : > { %1079 = vrot.lane.b32.xlu1 %v3334_v30, %s2668_s16 }
 0x183   : > { %1081 = vrot.lane.b32.xlu0 %v3289_v21, %s2668_s16 }
 0x185   : > { %1176 = vrot.lane.b32.xlu1 %v3334_v30, %s2669_s17 }
 0x187   : > { %1271 = vrot.lane.b32.xlu0 %v3322_v9, %s3850_s0 }
 0x189   : > { %1273 = vrot.lane.b32.xlu1 %v3334_v30, %s3850_s0  ;;  %s404_s0 = sand.u32 1, %s2653_s22  }
 0x18a   : > { %s2152_s16 = sshll.u32 %s404_s0, 4  ;;  %s3796_s25 = scalar_lea.sflag [#allocation3], %s404_s0 }
 0x18b   : > { %1433 = vperm.xlu0 %2471, %v2240_v33   ;;  %v3404_v33 = vld [vmem:[%s3838_s1] ss:$0 sm:$0xff] }
 0x18d   : > { %v623_v16 = vpop.permute.xlu0 %622  ;;  %1438 = vperm.xlu1 %2472, %v2241_v1  }
 0x18f   : > { %v625_v37 = vpop.permute.xlu1 %624  ;;  %1487 = vperm.xlu0 %2471, %v1461_v27   ;;  %v3411_v27 = vld [vmem:[%s3838_s1 + $0x2] ss:$0 sm:$0xff] }
 0x190   : > { %v644_v53 = vmul.f32 %v3404_v33, %v625_v37 }
 0x191   : > { %v718_v63 = vpop.permute.xlu0 %717  ;;  %1492 = vperm.xlu1 %2472, %v1462_v12   ;;  %v643_v12 = vmul.f32 %v3404_v33, %v623_v16 }
 0x192   : > { %v739_v1 = vmul.f32 %v3399_v32, %v718_v63  ;;  %v3425_v63 = vld [vmem:[%s3838_s1 + $0x3] ss:$0 sm:$0xff]  ;;  %v700_v19 = vmul.f32 %v3092_v41, %v644_v53  ;;  %v3458_v53 = vld [vmem:[%s3838_s1 + $0x6] ss:$0 sm:$0xff] }
 0x193   : > { %v720_v25 = vpop.permute.xlu1 %719  ;;  %1178 = vrot.lane.b32.xlu0 %v3289_v21, %s2669_s17 }
 0x194   : > { %v740_v35 = vmul.f32 %v3399_v32, %v720_v25  ;;  %v796_v50 = vmul.f32 %v3094_v42, %v739_v1 }
 0x195   : > { %v815_v60 = vpop.permute.xlu0 %814  ;;  %1180 = vrot.lane.b32.xlu1 %v3296_v28, %s2669_s17  ;;  %s3897_s17 = smov 112  }
 0x196   : > { %v836_v51 = vmul.f32 %v3411_v27, %v815_v60  ;;  %v699_v60 = vmul.f32 %v3090_v40, %v643_v12  ;;  %v797_v37 = vmul.f32 %v3096_v43, %v740_v35  ;;  %v1463_v40 = vld [vmem:[%s3842_s5 + $0x30] sm:$0xff]  ;;  %v3447_v43 = vld [vmem:[%s3838_s1 + $0x5] ss:$0 sm:$0xff] }
 0x197   : > { %v817_v58 = vpop.permute.xlu1 %816  ;;  %1368 = vrot.lane.b32.xlu0 %v3322_v9, %s2671_s18 }
 0x198   : > { %v837_v52 = vmul.f32 %v3411_v27, %v817_v58  ;;  %v893_v25 = vmul.f32 %v3102_v46, %v836_v51  ;;  %v804_v42 = vadd.f32 %v796_v50, %v699_v60  ;;  %v805_v46 = vadd.f32 %v797_v37, %v700_v19  ;;  %v1464_v51 = vld [vmem:[%s3842_s5 + $0x38] sm:$0xff]  ;;  %v3470_v60 = vld [vmem:[%s3838_s1 + $0x7] ss:$0 sm:$0xff] }
 0x199   : > { %v912_v16 = vpop.permute.xlu0 %911  ;;  %1370 = vrot.lane.b32.xlu1 %v3334_v30, %s2671_s18 }
 0x19a   : > { %v933_v9 = vmul.f32 %v3425_v63, %v912_v16  ;;  %v894_v58 = vmul.f32 %v3104_v47, %v837_v52  ;;  %v901_v50 = vadd.f32 %v893_v25, %v804_v42  ;;  %v1056_v42 = vmul.f32 %v3134_v6, %v3166_v4 }
 0x19b   : > { %v914_v59 = vpop.permute.xlu1 %913  ;;  %1275 = vrot.lane.b32.xlu0 %v3289_v21, %s3897_s17 }
 0x19c   : > { %v990_v1 = vmul.f32 %v3118_v54, %v933_v9  ;;  %v934_v30 = vmul.f32 %v3425_v63, %v914_v59  ;;  %v902_v54 = vadd.f32 %v894_v58, %v805_v46 }
 0x19d   : > { %v1074_v41 = vpop.permute.xlu0 %1073  ;;  %1277 = vrot.lane.b32.xlu1 %v3296_v28, %s3897_s17  ;;  %s406_s17 = scalar_lea.vmem [#allocation2], %s2152_s16  ;;  %s2603_s16 = sshll.u32 %s2675_s15, 4  ;;  %s2604_s16 = int_to_ptr.vmem [resolvable:$false] %s2603_s16 }
 0x19e   : > { %v991_v47 = vmul.f32 %v3120_v55, %v934_v30  ;;  %v998_v35 = vadd.f32 %v990_v1, %v901_v50  ;;  %v1095_v59 = vmul.f32 %v3447_v43, %v1074_v41  ;;  %v1055_v55 = vmul.f32 %v3132_v3, %v3164_v10  ;;  %s2086_s20 = sshll.u32 %s406_s17, 4  ;;  %s2605_s29 = scalar_lea.vmem %s2604_s16, 512  ;;  %s3788_s20 = int_to_ptr.vmem [resolvable:$true] %s2086_s20 }
 0x19f   : > { %v1076_v52 = vpop.permute.xlu1 %1075  ;;  %1497 = vperm.xlu0 %2471, %v1463_v40   ;;  %s2599_s30 = scalar_lea.vmem %s3788_s20, 256  ;;  %p2606_p0 = scmp.lt.s32.totalorder %s3788_s20, %s2604_s16 }
 0x1a0   : > { %v999_v19 = vadd.f32 %v991_v47, %v902_v54  ;;  %v1096_v30 = vmul.f32 %v3447_v43, %v1076_v52  ;;  %v1063_v37 = vadd.f32 %v1055_v55, %v998_v35  ;;  %v1152_v25 = vmul.f32 %v3170_v14, %v1095_v59  ;;  %v3484_v14 = vld [vmem:[%s3838_s1 + $0x8] ss:$0 sm:$0xff]  ;;  %p2600_p11 = scmp.ne.s32.totalorder %s3788_s20, %s2599_s30  ;;  %p2607_p1 = scmp.lt.s32.totalorder %s2605_s29, %s2599_s30 }
 0x1a1   : > { %v1171_v9 = vpop.permute.xlu0 %1170  ;;  %1502 = vperm.xlu1 %2472, %v1464_v51  }
 0x1a2   : > { %v1192_v12 = vmul.f32 %v3458_v53, %v1171_v9  ;;  %v1064_v58 = vadd.f32 %v1056_v42, %v999_v19  ;;  %v1153_v1 = vmul.f32 %v3174_v2, %v1096_v30  ;;  %v1160_v6 = vadd.f32 %v1152_v25, %v1063_v37  ;;  %p2601_p12 = pnand %p2600_p11, %p2781_p5  ;;  %p2608_p2 = por %p2607_p1, %p2606_p0 }
 0x1a3   : > { %v1173_v16 = vpop.permute.xlu1 %1172  ;;  %1372 = vrot.lane.b32.xlu0 %v3289_v21, %s2671_s18 }
 0x1a4   : > { %v1193_v3 = vmul.f32 %v3458_v53, %v1173_v16  ;;  %v1249_v40 = vmul.f32 %v3217_v24, %v1192_v12  ;;  %v1161_v52 = vadd.f32 %v1153_v1, %v1064_v58  ;;  %p2602_p13 = pneg %p2601_p12 }
 0x1a5   : > { %v1268_v10 = vpop.permute.xlu0 %1267  ;;  %1374 = vrot.lane.b32.xlu1 %v3296_v28, %s2671_s18 }
 0x1a6   : > { %v1289_v41 = vmul.f32 %v3470_v60, %v1268_v10  ;;  %v1250_v4 = vmul.f32 %v3222_v26, %v1193_v3  ;;  %v1257_v2 = vadd.f32 %v1249_v40, %v1160_v6  ;;  %p2609_p3 = pnand %p2608_p2, %p2602_p13 }
 0x1a7   : > { %v1270_v46 = vpop.permute.xlu1 %1269 }
 0x1a8   : > { %v1346_v50 = vmul.f32 %v3268_v13, %v1289_v41  ;;  %v1290_v47 = vmul.f32 %v3470_v60, %v1270_v46  ;;  %v1258_v59 = vadd.f32 %v1250_v4, %v1161_v52 }
 0x1a9   : > { %v1365_v51 = vpop.permute.xlu0 %1364 }
 0x1aa   : > { %v1347_v24 = vmul.f32 %v3272_v8, %v1290_v47  ;;  %v1386_v54 = vmul.f32 %v3484_v14, %v1365_v51  ;;  %v1354_v9 = vadd.f32 %v1346_v50, %v1257_v2 }
 0x1ab   : > { %v1367_v35 = vpop.permute.xlu1 %1366 }
 0x1ac   : > { %v1443_v19 = vmul.f32 %v3304_v18, %v1386_v54  ;;  %v1387_v55 = vmul.f32 %v3484_v14, %v1367_v35  ;;  %v1355_v26 = vadd.f32 %v1347_v24, %v1258_v59 }
 0x1ad   : > { %v619_v30 = vpop.permute.xlu0 %618 }
 0x1ae   : > { %v1451_v12 = vadd.f32 %v1443_v19, %v1354_v9  ;;  %v1444_v13 = vmul.f32 %v3308_v22, %v1387_v55  ;;  %v641_v40 = vmul.f32 %v3404_v33, %v619_v30 }
 0x1af   : > { %v621_v16 = vpop.permute.xlu1 %620 }
 0x1b0   : > { %v1452_v37 = vadd.f32 %v1444_v13, %v1355_v26  ;;  %v3495_v25 = vadd.f32 %v3368_v0, %v1451_v12  ;;  %v642_v46 = vmul.f32 %v3404_v33, %v621_v16  ;;  %v697_v47 = vmul.f32 %v3063_v29, %v641_v40 }
 0x1b1   : > { %v714_v8 = vpop.permute.xlu0 %713 }
 0x1b2   : > { %v1515_v42 = vsub.f32 0.0, %v3495_v25  ;;  %v3499_v3 = vadd.f32 %v3372_v17, %v1452_v37  ;;  %v737_v18 = vmul.f32 %v3399_v32, %v714_v8  ;;  %v698_v54 = vmul.f32 %v3068_v31, %v642_v46 }
 0x1b3   : > { %v716_v10 = vpop.permute.xlu1 %715 }
 0x1b4   : > { %v1525_v58 = vmul.f32 1.442695, %v1515_v42  ;;  %v1516_v1 = vsub.f32 0.0, %v3499_v3  ;;  %v738_v22 = vmul.f32 %v3399_v32, %v716_v10  ;;  %v794_v6 = vmul.f32 %v3076_v34, %v737_v18 }
 0x1b5   : > { %v811_v41 = vpop.permute.xlu0 %810 }
 0x1b6   : > { %v834_v0 = vmul.f32 %v3411_v27, %v811_v41  ;;  %2529 = vpow2.f32 %v1525_v58  ;;  %v1527_v4 = vmul.f32 1.442695, %v1516_v1  ;;  %v795_v51 = vmul.f32 %v3081_v36, %v738_v22 }
 0x1b7   : > { %v813_v17 = vpop.permute.xlu1 %812  ;;  %v802_v35 = vadd.f32 %v794_v6, %v697_v47 }
 0x1b8   : > { %v835_v50 = vmul.f32 %v3411_v27, %v813_v17  ;;  %v891_v52 = vmul.f32 %v3086_v38, %v834_v0  ;;  %2531 = vpow2.f32 %v1527_v4  ;;  %v803_v55 = vadd.f32 %v795_v51, %v698_v54 }
 0x1b9   : > { %v908_v2 = vpop.permute.xlu0 %907 }
 0x1ba   : > { %v931_v24 = vmul.f32 %v3425_v63, %v908_v2  ;;  %v892_v59 = vmul.f32 %v3088_v39, %v835_v50  ;;  %v899_v29 = vadd.f32 %v891_v52, %v802_v35  ;;  %v1053_v39 = vmul.f32 %v3106_v48, %v3227_v7 }
 0x1bb   : > { %v910_v34 = vpop.permute.xlu1 %909 }
 0x1bc   : > { %v988_v9 = vmul.f32 %v3098_v44, %v931_v24  ;;  %v932_v19 = vmul.f32 %v3425_v63, %v910_v34  ;;  %v900_v38 = vadd.f32 %v892_v59, %v803_v55  ;;  %v3898_v55 = vld [vmem:[#allocation30_spill] sm:$0xff] }
 0x1bd   : > { %v1070_v30 = vpop.permute.xlu0 %1069 }
 0x1be   : > { %v989_v36 = vmul.f32 %v3100_v45, %v932_v19  ;;  %v996_v26 = vadd.f32 %v988_v9, %v899_v29  ;;  %v1093_v16 = vmul.f32 %v3447_v43, %v1070_v30  ;;  %v1054_v45 = vmul.f32 %v3108_v49, %v3232_v20 }
 0x1bf   : > { %v1072_v12 = vpop.permute.xlu1 %1071 }
 0x1c0   : > { %v2530_v13 = vpop.eup %2529  ;;  %v997_v31 = vadd.f32 %v989_v36, %v900_v38  ;;  %v1094_v44 = vmul.f32 %v3447_v43, %v1072_v12  ;;  %v1061_v10 = vadd.f32 %v1053_v39, %v996_v26  ;;  %v1150_v1 = vmul.f32 %v3122_v56, %v1093_v16  ;;  %v3899_v26 = vld [vmem:[#allocation31_spill] sm:$0xff] }
 0x1c1   : > { %v1167_v37 = vpop.permute.xlu0 %1166  ;;  %v1539_v8 = vadd.f32 1.0, %v2530_v13 }
 0x1c2   : > { %v1190_v42 = vmul.f32 %v3458_v53, %v1167_v37  ;;  %v2532_v18 = vpop.eup %2531  ;;  %v1062_v41 = vadd.f32 %v1054_v45, %v997_v31  ;;  %v1151_v7 = vmul.f32 %v3124_v57, %v1094_v44  ;;  %v1158_v17 = vadd.f32 %v1150_v1, %v1061_v10 }
 0x1c3   : > { %v1169_v58 = vpop.permute.xlu1 %1168  ;;  %2533 = vrcp.f32 %v1539_v8  ;;  %v1540_v22 = vadd.f32 1.0, %v2532_v18 }
 0x1c4   : > { %v1191_v40 = vmul.f32 %v3458_v53, %v1169_v58  ;;  %v1247_v0 = vmul.f32 %v3138_v11, %v1190_v42  ;;  %v1159_v50 = vadd.f32 %v1151_v7, %v1062_v41 }
 0x1c5   : > { %v1264_v48 = vpop.permute.xlu0 %1263  ;;  %2535 = vrcp.f32 %v1540_v22 }
 0x1c6   : > { %v1287_v46 = vmul.f32 %v3470_v60, %v1264_v48  ;;  %v1248_v49 = vmul.f32 %v3142_v15, %v1191_v40  ;;  %v1255_v47 = vadd.f32 %v1247_v0, %v1158_v17 }
 0x1c7   : > { %v1266_v6 = vpop.permute.xlu1 %1265 }
 0x1c8   : > { %v1344_v20 = vmul.f32 %v3180_v61, %v1287_v46  ;;  %v1288_v56 = vmul.f32 %v3470_v60, %v1266_v6  ;;  %v1256_v11 = vadd.f32 %v1248_v49, %v1159_v50 }
 0x1c9   : > { %v1361_v4 = vpop.permute.xlu0 %1360 }
 0x1ca   : > { %v1345_v51 = vmul.f32 %v3184_v5, %v1288_v56  ;;  %v1384_v57 = vmul.f32 %v3484_v14, %v1361_v4  ;;  %v1352_v2 = vadd.f32 %v1344_v20, %v1255_v47 }
 0x1cb   : > { %v1363_v52 = vpop.permute.xlu1 %1362 }
 0x1cc   : > { %v1441_v24 = vmul.f32 %v3234_v23, %v1384_v57  ;;  %v1385_v54 = vmul.f32 %v3484_v14, %v1363_v52  ;;  %v1353_v61 = vadd.f32 %v1345_v51, %v1256_v11 }
 0x1cd   : > { %v3537_v35 = vpop.permute.xlu0 %630  ;;  %v2534_v15 = vpop.eup %2533 }
 0x1ce   : > { %v1449_v59 = vadd.f32 %v1441_v24, %v1352_v2  ;;  %v1442_v34 = vmul.f32 %v3238_v62, %v1385_v54  ;;  %v3546_v36 = vmul.f32 %v2534_v15, %v3495_v25  ;;  %v2672_v24 = vmov 0.0|0.0   ;;  %v3900_v54 = vld [vmem:[#allocation8_spill] sm:$0xff] }
 0x1cf   : > { %v3540_v9 = vpop.permute.xlu1 %632  ;;  %v2536_v19 = vpop.eup %2535  ;;  %2382 = vmatprep.subr.bf16.mxu1 %v2672_v24 }
 0x1d0   : > { %v1450_v5 = vadd.f32 %v1442_v34, %v1353_v61  ;;  %v1505_v29 = vadd.f32 %v3898_v55, %v1449_v59  ;;  %v3549_v23 = vmul.f32 %v2536_v19, %v3499_v3 }
 0x1d1   : > { %v3543_v30 = vpop.permute.xlu0 %725 }
 0x1d2   : > { %v1513_v38 = vsub.f32 0.0, %v1505_v29  ;;  %v1506_v12 = vadd.f32 %v3899_v26, %v1450_v5  ;;  %v2009_v62 = vpack.c.bf16 %v3549_v23, %v3546_v36  ;;  %v3901_v5 = vld [vmem:[#allocation6_spill] sm:$0xff]  ;;  %v3903_v26 = vld [vmem:[#allocation9_spill] sm:$0xff] }
 0x1d3   : > { %v3552_v13 = vpop.permute.xlu1 %727 }
 0x1d4   : > { %v1521_v16 = vmul.f32 1.442695, %v1513_v38  ;;  %v1514_v31 = vsub.f32 0.0, %v1506_v12 }
 0x1d5   : > { %v3556_v39 = vpop.permute.xlu0 %822 }
 0x1d6   : > { %2537 = vpow2.f32 %v1521_v16  ;;  %v1523_v25 = vmul.f32 1.442695, %v1514_v31 }
 0x1d7   : > { %v3558_v37 = vpop.permute.xlu1 %824 }
 0x1d8   : > { %2539 = vpow2.f32 %v1523_v25 }
 0x1d9   : > { %v3560_v8 = vpop.permute.xlu0 %919 }
 0x1db   : > { %v3562_v3 = vpop.permute.xlu1 %921 }
 0x1dd   : > { %v627_v44 = vpop.permute.xlu0 %626 }
 0x1de   : > { %v645_v52 = vmul.f32 %v3404_v33, %v627_v44  ;;  %v3904_v44 = vld [vmem:[#allocation7_spill] sm:$0xff] }
 0x1df   : > { %v3564_v42 = vpop.permute.xlu1 %1083 }
 0x1e0   : > { %v2538_v18 = vpop.eup %2537  ;;  %v701_v55 = vmul.f32 %v3901_v5, %v645_v52  ;;  %v743_v52 = vmul.f32 %v3399_v32, %v3543_v30  ;;  %v3910_v5 = vld [vmem:[#allocation35_spill] sm:$0xff]  ;;  %v648_v30 = vmul.f32 %v3404_v33, %v3540_v9  ;;  %v938_v9 = vmul.f32 %v3425_v63, %v3562_v3  ;;  %v3922_v3 = vld [vmem:[#allocation36_spill] sm:$0xff] }
 0x1e1   : > { %v1537_v10 = vadd.f32 1.0, %v2538_v18  ;;  %v722_v45 = vpop.permute.xlu0 %721 }
 0x1e2   : > { %v2540_v58 = vpop.eup %2539  ;;  %v741_v51 = vmul.f32 %v3399_v32, %v722_v45 }
 0x1e3   : > { %2541 = vrcp.f32 %v1537_v10  ;;  %v629_v1 = vpop.permute.xlu1 %628  ;;  %v1538_v40 = vadd.f32 1.0, %v2540_v58  ;;  %v3905_v10 = vld [vmem:[#allocation16_spill] sm:$0xff]  ;;  %v3906_v58 = vld [vmem:[#allocation11_spill] sm:$0xff] }
 0x1e4   : > { %v798_v15 = vmul.f32 %v3900_v54, %v741_v51  ;;  %v646_v61 = vmul.f32 %v3404_v33, %v629_v1  ;;  %v3909_v54 = vld [vmem:[#allocation20_spill] sm:$0xff] }
 0x1e5   : > { %2543 = vrcp.f32 %v1538_v40  ;;  %v819_v22 = vpop.permute.xlu0 %818 }
 0x1e6   : > { %v838_v11 = vmul.f32 %v3411_v27, %v819_v22  ;;  %v806_v25 = vadd.f32 %v798_v15, %v701_v55  ;;  %v702_v18 = vmul.f32 %v3904_v44, %v646_v61  ;;  %v3911_v55 = vld [vmem:[#allocation21_spill] sm:$0xff]  ;;  %v3913_v44 = vld [vmem:[#allocation14_spill] sm:$0xff] }
 0x1e7   : > { %v724_v41 = vpop.permute.xlu1 %723 }
 0x1e8   : > { %v742_v2 = vmul.f32 %v3399_v32, %v724_v41 }
 0x1e9   : > { %v916_v7 = vpop.permute.xlu0 %915 }
 0x1ea   : > { %v935_v59 = vmul.f32 %v3425_v63, %v916_v7 }
 0x1eb   : > { %v821_v6 = vpop.permute.xlu1 %820 }
 0x1ec   : > { %v839_v34 = vmul.f32 %v3411_v27, %v821_v6  ;;  %v992_v45 = vmul.f32 %v3905_v10, %v935_v59 }
 0x1ed   : > { %v2542_v48 = vpop.eup %2541  ;;  %v1078_v20 = vpop.permute.xlu0 %1077 }
 0x1ee   : > { %v3566_v0 = vmul.f32 %v2542_v48, %v1505_v29  ;;  %v3902_v29 = vld [vmem:[#allocation10_spill] sm:$0xff]  ;;  %v896_v1 = vmul.f32 %v3906_v58, %v839_v34  ;;  %v3907_v48 = vld [vmem:[#allocation17_spill] sm:$0xff] }
 0x1ef   : > { %v2544_v46 = vpop.eup %2543  ;;  %v918_v56 = vpop.permute.xlu1 %917  ;;  %v895_v38 = vmul.f32 %v3902_v29, %v838_v11  ;;  %v744_v11 = vmul.f32 %v3399_v32, %v3552_v13  ;;  %v1058_v29 = vmul.f32 %v3911_v55, %v3910_v5  ;;  %v840_v32 = vmul.f32 %v3411_v27, %v3556_v39  ;;  %v3916_v58 = vld [vmem:[#allocation25_spill] sm:$0xff]  ;;  %v3924_v5 = vld [vmem:[#allocation23_spill] sm:$0xff] }
 0x1f0   : > { %1561 = vadd.xlane.f32.xlu0 %v3566_v0  ;;  %v3569_v17 = vmul.f32 %v2544_v46, %v1506_v12  ;;  %v799_v12 = vmul.f32 %v3903_v26, %v742_v2  ;;  %v936_v16 = vmul.f32 %v3425_v63, %v918_v56  ;;  %v1097_v56 = vmul.f32 %v3447_v43, %v1078_v20  ;;  %v3908_v2 = vld [vmem:[#allocation32_spill] sm:$0xff] }
 0x1f1   : > { %v1175_v4 = vpop.permute.xlu0 %1174  ;;  %v903_v22 = vadd.f32 %v895_v38, %v806_v25  ;;  %v1057_v15 = vmul.f32 %v3909_v54, %v3908_v2  ;;  %v647_v20 = vmul.f32 %v3404_v33, %v3537_v35  ;;  %v841_v13 = vmul.f32 %v3411_v27, %v3558_v37  ;;  %v3914_v35 = vld [vmem:[#allocation15_spill] sm:$0xff]  ;;  %v3915_v27 = vld [vmem:[#allocation28_spill] sm:$0xff] }
 0x1f2   : > { %1563 = vadd.xlane.f32.xlu1 %v3569_v17  ;;  %v2008_v49 = vpack.c.bf16 %v3569_v17, %v3566_v0  ;;  %v807_v41 = vadd.f32 %v799_v12, %v702_v18  ;;  %v993_v7 = vmul.f32 %v3907_v48, %v936_v16  ;;  %v1194_v34 = vmul.f32 %v3458_v53, %v1175_v4  ;;  %v3912_v4 = vld [vmem:[#allocation24_spill] sm:$0xff]  ;;  %v1672_v0 = vld [vmem:[%s3845_s8 + $0x28] sm:$0xff] }
 0x1f3   : > { %v1080_v50 = vpop.permute.xlu1 %1079  ;;  %v1000_v6 = vadd.f32 %v992_v45, %v903_v22  ;;  %v1154_v16 = vmul.f32 %v3912_v4, %v1097_v56  ;;  %v800_v18 = vmul.f32 %v3913_v44, %v743_v52  ;;  %v801_v10 = vmul.f32 %v3914_v35, %v744_v11  ;;  %v3917_v22 = vld [vmem:[#allocation12_spill] sm:$0xff]  ;;  %v3921_v11 = vld [vmem:[#allocation29_spill] sm:$0xff] }
 0x1f4   : > { %1565 = vadd.xlane.f32.xlu0 %v3546_v36  ;;  %v904_v51 = vadd.f32 %v896_v1, %v807_v41  ;;  %v1098_v38 = vmul.f32 %v3447_v43, %v1080_v50  ;;  %v937_v33 = vmul.f32 %v3425_v63, %v3560_v8  ;;  %v1251_v37 = vmul.f32 %v3915_v27, %v1194_v34  ;;  %v3918_v41 = vld [vmem:[#allocation13_spill] sm:$0xff]  ;;  %v3926_v44 = vld [vmem:[#allocation40_spill] sm:$0xff] }
 0x1f5   : > { %v3576_v47 = vpop.permute.xlu0 %1081  ;;  %v1065_v12 = vadd.f32 %v1057_v15, %v1000_v6  ;;  %v704_v48 = vmul.f32 %v3918_v41, %v648_v30  ;;  %v1673_v17 = vld [vmem:[%s3845_s8 + $0x30] sm:$0xff]  ;;  %v1674_v36 = vld [vmem:[%s3845_s8 + $0x38] sm:$0xff] }
 0x1f6   : > { %v1001_v59 = vadd.f32 %v993_v7, %v904_v51  ;;  %v1155_v1 = vmul.f32 %v3916_v58, %v1098_v38  ;;  %v3919_v7 = vld [vmem:[#allocation18_spill] sm:$0xff]  ;;  %v3920_v51 = vld [vmem:[#allocation19_spill] sm:$0xff] }
 0x1f7   : > { %v1177_v57 = vpop.permute.xlu1 %1176  ;;  %v897_v6 = vmul.f32 %v3919_v7, %v840_v32  ;;  %v898_v56 = vmul.f32 %v3920_v51, %v841_v13  ;;  %v1162_v52 = vadd.f32 %v1154_v16, %v1065_v12  ;;  %v809_v15 = vadd.f32 %v801_v10, %v704_v48  ;;  %v3930_v48 = vld [vmem:[#allocation33_spill] sm:$0xff] }
 0x1f8   : > { %1567 = vadd.xlane.f32.xlu0 %v3549_v23  ;;  %v1195_v25 = vmul.f32 %v3458_v53, %v1177_v57  ;;  %v1066_v45 = vadd.f32 %v1058_v29, %v1001_v59  ;;  %v3923_v59 = vld [vmem:[#allocation22_spill] sm:$0xff]  ;;  %v1099_v12 = vmul.f32 %v3447_v43, %v3576_v47  ;;  %v3928_v47 = vld [vmem:[#allocation27_spill] sm:$0xff] }
 0x1f9   : > { %v1272_v19 = vpop.permute.xlu0 %1271  ;;  %v994_v34 = vmul.f32 %v3923_v59, %v937_v33  ;;  %v1259_v29 = vadd.f32 %v1251_v37, %v1162_v52  ;;  %v906_v4 = vadd.f32 %v898_v56, %v809_v15  ;;  %v3931_v52 = vld [vmem:[#allocation34_spill] sm:$0xff]  ;;  %v1676_v23 = vld [vmem:[%s3846_s9 + $0x8] sm:$0xff] }
 0x1fa   : > { %v1291_v50 = vmul.f32 %v3470_v60, %v1272_v19  ;;  %v703_v19 = vmul.f32 %v3917_v22, %v647_v20  ;;  %v1252_v63 = vmul.f32 %v3921_v11, %v1195_v25  ;;  %v1163_v38 = vadd.f32 %v1155_v1, %v1066_v45  ;;  %v3925_v20 = vld [vmem:[#allocation37_spill] sm:$0xff] }
 0x1fb   : > { %v1274_v31 = vpop.permute.xlu1 %1273  ;;  %v3927_v1 = vld [vmem:[#allocation41_spill] sm:$0xff]  ;;  %v1060_v22 = vmul.f32 %v3928_v47, %v3296_v28  ;;  %v1156_v7 = vmul.f32 %v3930_v48, %v1099_v12 }
 0x1fc   : > { %v1292_v57 = vmul.f32 %v3470_v60, %v1274_v31  ;;  %v1348_v2 = vmul.f32 %v3922_v3, %v1291_v50  ;;  %v808_v54 = vadd.f32 %v800_v18, %v703_v19  ;;  %v995_v31 = vmul.f32 %v3924_v5, %v938_v9  ;;  %v3929_v19 = vld [vmem:[#allocation26_spill] sm:$0xff] }
 0x1fd   : > { %v1260_v25 = vadd.f32 %v1252_v63, %v1163_v38  ;;  %v1100_v9 = vmul.f32 %v3447_v43, %v3564_v42  ;;  %v1059_v41 = vmul.f32 %v3929_v19, %v3289_v21  ;;  %v3932_v3 = vld [vmem:[#allocation38_spill] sm:$0xff] }
 0x1fe   : > { %v1349_v30 = vmul.f32 %v3925_v20, %v1292_v57  ;;  %v905_v13 = vadd.f32 %v897_v6, %v808_v54  ;;  %v1356_v50 = vadd.f32 %v1348_v2, %v1259_v29  ;;  %v1003_v33 = vadd.f32 %v995_v31, %v906_v4  ;;  %v3934_v5 = vld [vmem:[#allocation42_spill] sm:$0xff] }
 0x1ff   : > { %v1157_v11 = vmul.f32 %v3931_v52, %v1100_v9  ;;  %v2674_v52 = vmov 0.0  }
 0x200   : > { %v1002_v10 = vadd.f32 %v994_v34, %v905_v13  ;;  %v1357_v45 = vadd.f32 %v1349_v30, %v1260_v25  ;;  %v3933_v34 = vld [vmem:[#allocation39_spill] sm:$0xff]  ;;  %2334 = vmatprep.mubr.msk.f32.mxu1 %vm2673_vm1, %v2674_v52 }
 0x201   : > { %v3935_v30 = vld [vmem:[#allocation43_spill] sm:$0xff] }
 0x202   : > { %v1067_v63 = vadd.f32 %v1059_v41, %v1002_v10 }
 0x204   : > { %v1164_v59 = vadd.f32 %v1156_v7, %v1067_v63 }
 0x20a   : > { %v3594_v40 = vpop.permute.xlu0 %1433 }
 0x20c   : > { %v3597_v46 = vpop.permute.xlu1 %1438 }
 0x20e   : > { %v3606_v61 = vpop.permute.xlu0 %1487 }
 0x210   : > { %v1493_v26 = vpop.permute.xlu1 %1492 }
 0x212   : > { %v1179_v39 = vpop.permute.xlu0 %1178 }
 0x213   : > { %v1196_v27 = vmul.f32 %v3458_v53, %v1179_v39  ;;  %v1068_v39 = vadd.f32 %v1060_v22, %v1003_v33 }
 0x214   : > { %v1181_v8 = vpop.permute.xlu1 %1180 }
 0x215   : > { %v1197_v6 = vmul.f32 %v3458_v53, %v1181_v8  ;;  %v1253_v2 = vmul.f32 %v3932_v3, %v1196_v27 }
 0x216   : > { %v1369_v55 = vpop.permute.xlu0 %1368 }
 0x217   : > { %v1388_v32 = vmul.f32 %v3484_v14, %v1369_v55  ;;  %v1254_v53 = vmul.f32 %v3933_v34, %v1197_v6  ;;  %v1261_v38 = vadd.f32 %v1253_v2, %v1164_v59 }
 0x218   : > { %v1371_v16 = vpop.permute.xlu1 %1370 }
 0x219   : > { %v1445_v18 = vmul.f32 %v3926_v44, %v1388_v32  ;;  %v1389_v35 = vmul.f32 %v3484_v14, %v1371_v16 }
 0x21a   : > { %v1276_v37 = vpop.permute.xlu0 %1275 }
 0x21b   : > { %v1453_v58 = vadd.f32 %v1445_v18, %v1356_v50  ;;  %v1446_v57 = vmul.f32 %v3927_v1, %v1389_v35  ;;  %v1293_v43 = vmul.f32 %v3470_v60, %v1276_v37 }
 0x21c   : > { %v1278_v51 = vpop.permute.xlu1 %1277 }
 0x21d   : > { %v1454_v56 = vadd.f32 %v1446_v57, %v1357_v45  ;;  %v1509_v42 = vadd.f32 %v3606_v61, %v1453_v58  ;;  %v1294_v54 = vmul.f32 %v3470_v60, %v1278_v51  ;;  %v1350_v31 = vmul.f32 %v3934_v5, %v1293_v43 }
 0x21e   : > { %v1498_v28 = vpop.permute.xlu0 %1497  ;;  %v1165_v61 = vadd.f32 %v1157_v11, %v1068_v39 }
 0x21f   : > { %v1517_v21 = vsub.f32 0.0, %v1509_v42  ;;  %v1510_v15 = vadd.f32 %v1493_v26, %v1454_v56  ;;  %v1351_v32 = vmul.f32 %v3935_v30, %v1294_v54  ;;  %v1358_v26 = vadd.f32 %v1350_v31, %v1261_v38 }
 0x220   : > { %v1503_v8 = vpop.permute.xlu1 %1502  ;;  %v1262_v60 = vadd.f32 %v1254_v53, %v1165_v61 }
 0x221   : > { %v1529_v55 = vmul.f32 1.442695, %v1517_v21  ;;  %v1518_v29 = vsub.f32 0.0, %v1510_v15 }
 0x222   : > { %v1373_v20 = vpop.permute.xlu0 %1372  ;;  %v1359_v50 = vadd.f32 %v1351_v32, %v1262_v60  ;;  %v1585_v32 = vld [vmem:[%s3843_s6] sm:$0xf] }
 0x223   : > { %v1390_v13 = vmul.f32 %v3484_v14, %v1373_v20  ;;  %2545 = vpow2.f32 %v1529_v55  ;;  %v1531_v4 = vmul.f32 1.442695, %v1518_v29 }
 0x224   : > { %v1375_v12 = vpop.permute.xlu1 %1374 }
 0x225   : > { %v1447_v16 = vmul.f32 %v3594_v40, %v1390_v13  ;;  %v1391_v25 = vmul.f32 %v3484_v14, %v1375_v12  ;;  %2547 = vpow2.f32 %v1531_v4  ;;  %v1667_v13 = vld [vmem:[%s3845_s8] sm:$0xff] }
 0x226   : > { %2339 = vmatprep.mubr.msk.f32.mxu0 %vm1683_vm3, %v1667_v13 }
 0x227   : > { %v1455_v44 = vadd.f32 %v1447_v16, %v1358_v26  ;;  %v1448_v18 = vmul.f32 %v3597_v46, %v1391_v25 }
 0x229   : > { %v1456_v35 = vadd.f32 %v1448_v18, %v1359_v50  ;;  %v1511_v10 = vadd.f32 %v1498_v28, %v1455_v44 }
 0x22b   : > { %v1519_v33 = vsub.f32 0.0, %v1511_v10  ;;  %v1512_v9 = vadd.f32 %v1503_v8, %v1456_v35  ;;  %v1668_v35 = vld [vmem:[%s3845_s8 + $0x8] sm:$0xff] }
 0x22d   : > { %v2546_v27 = vpop.eup %2545  ;;  %v1533_v37 = vmul.f32 1.442695, %v1519_v33  ;;  %v1520_v45 = vsub.f32 0.0, %v1512_v9  ;;  %v1670_v33 = vld [vmem:[%s3845_s8 + $0x18] sm:$0xff] }
 0x22e   : > { %v1541_v58 = vadd.f32 1.0, %v2546_v27 }
 0x22f   : > { %v2548_v1 = vpop.eup %2547  ;;  %2549 = vpow2.f32 %v1533_v37  ;;  %v1535_v57 = vmul.f32 1.442695, %v1520_v45 }
 0x230   : > { %2551 = vrcp.f32 %v1541_v58  ;;  %v1542_v40 = vadd.f32 1.0, %v2548_v1  ;;  %v1678_v58 = vld [vmem:[%s3846_s9 + $0x18] sm:$0xff] }
 0x231   : > { %2553 = vpow2.f32 %v1535_v57  ;;  %v1677_v57 = vld [vmem:[%s3846_s9 + $0x10] sm:$0xff] }
 0x232   : > { %2555 = vrcp.f32 %v1542_v40 }
 0x239   : > { %v2550_v14 = vpop.eup %2549 }
 0x23a   : > { %v2552_v47 = vpop.eup %2551  ;;  %v1543_v22 = vadd.f32 1.0, %v2550_v14 }
 0x23b   : > { %v2554_v19 = vpop.eup %2553  ;;  %v3668_v46 = vmul.f32 %v2552_v47, %v1509_v42 }
 0x23c   : > { %v2556_v41 = vpop.eup %2555  ;;  %2557 = vrcp.f32 %v1543_v22  ;;  %v1544_v48 = vadd.f32 1.0, %v2554_v19 }
 0x23d   : > { %1569 = vadd.xlane.f32.xlu1 %v3668_v46  ;;  %v3671_v7 = vmul.f32 %v2556_v41, %v1510_v15 }
 0x23e   : > { %2559 = vrcp.f32 %v1544_v48  ;;  %v1680_v48 = vld [vmem:[%s3846_s9 + $0x28] sm:$0xff] }
 0x23f   : > { %v2010_v6 = vpack.c.bf16 %v3671_v7, %v3668_v46  ;;  %1571 = vadd.xlane.f32.xlu0 %v3671_v7 }
 0x246   : > { %v2558_v51 = vpop.eup %2557 }
 0x247   : > { %v3676_v56 = vmul.f32 %v2558_v51, %v1511_v10  ;;  %v1669_v10 = vld [vmem:[%s3845_s8 + $0x10] sm:$0xff] }
 0x248   : > { %v2560_v43 = vpop.eup %2559 }
 0x249   : > { %1573 = vadd.xlane.f32.xlu1 %v3676_v56  ;;  %v3679_v42 = vmul.f32 %v2560_v43, %v1512_v9  ;;  %v1671_v9 = vld [vmem:[%s3845_s8 + $0x20] sm:$0xff] }
 0x24b   : > { %v2011_v39 = vpack.c.bf16 %v3679_v42, %v3676_v56  ;;  %1575 = vadd.xlane.f32.xlu0 %v3679_v42 }
 0x27d   : > { %v1562_v11 = vpop.xlane.xlu0 %1561 }
 0x27e   : > { %v1577_v3 = vmul.f32 0.0078125, %v1562_v11 }
 0x27f   : > { %v1564_v63 = vpop.xlane.xlu1 %1563 }
 0x280   : > { %v1578_v2 = vmul.f32 0.0078125, %v1564_v63  ;;  %v1682_v63 = vld [vmem:[%s3846_s9 + $0x38] sm:$0xff] }
 0x281   : > { %v1566_v28 = vpop.xlane.xlu0 %1565 }
 0x282   : > { %v2383_v54 = vpack.c.bf16 %v1578_v2, %v1577_v3  ;;  %v1579_v15 = vmul.f32 0.0078125, %v1566_v28  ;;  %v1681_v2 = vld [vmem:[%s3846_s9 + $0x30] sm:$0xff] }
 0x284   : > { %2384 = vmatpush3.bf16.msra.mxu1 %v2383_v54 }
 0x285   : > { %v1568_v21 = vpop.xlane.xlu0 %1567  ;;  %2385 = vmatprep.subr.bf16.mxu1 %v2672_v24 }
 0x286   : > { %v1580_v59 = vmul.f32 0.0078125, %v1568_v21 }
 0x288   : > { %v2386_v34 = vpack.c.bf16 %v1580_v59, %v1579_v15 }
 0x28a   : > { %2387 = vmatpush3.bf16.msra.mxu1 %v2386_v34 }
 0x28b   : > { %2388 = vmatprep.subr.bf16.mxu1 %v2672_v24 }
 0x2ca   : > { %v1570_v53 = vpop.xlane.xlu1 %1569 }
 0x2cb   : > { %v1581_v5 = vmul.f32 0.0078125, %v1570_v53 }
 0x2cc   : > { %v1572_v8 = vpop.xlane.xlu0 %1571 }
 0x2cd   : > { %v1582_v31 = vmul.f32 0.0078125, %v1572_v8 }
 0x2cf   : > { %v2389_v55 = vpack.c.bf16 %v1582_v31, %v1581_v5 }
 0x2d1   : > { %2390 = vmatpush3.bf16.msra.mxu1 %v2389_v55 }
 0x2d2   : > { %2391 = vmatprep.subr.bf16.mxu1 %v2672_v24  ;;  %v1586_v24 = vld [vmem:[%s3844_s7] sm:$0xf] }
 0x2d6   : > { %v1574_v29 = vpop.xlane.xlu1 %1573 }
 0x2d7   : > { %v1583_v38 = vmul.f32 0.0078125, %v1574_v29 }
 0x2d8   : > { %v1576_v61 = vpop.xlane.xlu0 %1575 }
 0x2d9   : > { %v1584_v20 = vmul.f32 0.0078125, %v1576_v61 }
 0x2db   : > { %v2392_v30 = vpack.c.bf16 %v1584_v20, %v1583_v38 }
 0x2dd   : > { %2393 = vmatpush3.bf16.msra.mxu1 %v2392_v30 }
 0x2e0   : > { %2335 = vmatmul.mubr.msk.f32.vlgmr.msra.gmra.mrb[8].mxu1 %vm1587_vm2, %v1585_v32 }
 0x3b3   : > { %v1657_v4 = vpop.f32.mrb[8].mxu1 }
 0x3b4   : > { %v1658_v60 = vadd.f32 %v1657_v4, %v1586_v24  ;;  %v2336_v12 = vpop.f32.mrb[9].mxu1 }
 0x3b6   : > { %v1661_v26 = vsub.f32 0.0, %v1658_v60 }
 0x3b8   : > { %v1662_v16 = vmul.f32 1.442695, %v1661_v26 }
 0x3ba   : > { %2561 = vpow2.f32 %v1662_v16 }
 0x3c4   : > { %v2562_v25 = vpop.eup %2561 }
 0x3c5   : > { %v1664_v50 = vadd.f32 1.0, %v2562_v25 }
 0x3c7   : > { %2563 = vrcp.f32 %v1664_v50 }
 0x3d1   : > { %v2564_v44 = vpop.eup %2563 }
 0x3d2   : > { %v1666_v18 = vmul.f32 %v2564_v44, %v1658_v60 }
 0x3d4   : > { %2337 = vmatprep.subr.msk.mxu0 %vm1708_vm4, %v1666_v18 }
 0x3d5   : > { %2338 = vmatpush3.msk.msra.mxu0 %vm1708_vm4, %v1666_v18 }
 0x3d6   : > { %2340 = vmatmul.mubr.msk.f32.vlgmr.msra.gmra.mrb[0].mxu0 %vm1683_vm3, %v1668_v35  ;;  %2370 = vmatprep.subr.bf16.mxu0 %v2674_v52 }
 0x3d7   : > { %2371 = vmatpush3.bf16.msra.mxu0 %v2008_v49  ;;  %2342 = vmatprep.mubr.msk.f32.mxu0 %vm1683_vm3, %v1669_v10 }
 0x3d8   : > { %2372 = vmatprep.subr.bf16.mxu0 %v2674_v52 }
 0x3da   : > { %2343 = vmatmul.mubr.msk.f32.gmra.mrb[2].mxu0 %vm1683_vm3, %v1670_v33 }
 0x3db   : > { %2373 = vmatpush3.bf16.msra.mxu0 %v2009_v62  ;;  %2345 = vmatprep.mubr.msk.f32.mxu0 %vm1683_vm3, %v1671_v9  ;;  %v1675_v62 = vld [vmem:[%s3846_s9] sm:$0xff] }
 0x3dc   : > { %2374 = vmatprep.subr.bf16.mxu0 %v2674_v52 }
 0x3de   : > { %2346 = vmatmul.mubr.msk.f32.gmra.mrb[4].mxu0 %vm1683_vm3, %v1672_v0 }
 0x3df   : > { %2375 = vmatpush3.bf16.msra.mxu0 %v2010_v6  ;;  %2348 = vmatprep.mubr.msk.f32.mxu0 %vm1683_vm3, %v1673_v17  ;;  %v1679_v6 = vld [vmem:[%s3846_s9 + $0x20] sm:$0xff] }
 0x3e0   : > { %2376 = vmatprep.subr.bf16.mxu0 %v2674_v52 }
 0x3e2   : > { %2349 = vmatmul.mubr.msk.f32.gmra.mrb[6].mxu0 %vm1683_vm3, %v1674_v36 }
 0x3e3   : > { %2377 = vmatpush3.bf16.msra.mxu0 %v2011_v39  ;;  %2378 = vmatprep.mubr.msk.bf16.mxu0 %vm2673_vm1, %v2674_v52 }
 0x4a9   : > { %v2341_v49 = vpop.f32.mrb[0].mxu0 }
 0x4aa   : > { %v1784_v27 = vadd.f32 %v2341_v49, %v1676_v23  ;;  %v1778_v37 = vpop.f32.mrb[1].mxu0  ;;  %v2012_v23 = vld [vmem:[%s3848_s11] sm:$0xff] }
 0x4ab   : > { %v1779_v45 = vadd.f32 %v1778_v37, %v1675_v62 }
 0x4ac   : > { %v1818_v1 = vsub.f32 0.0, %v1784_v27 }
 0x4ad   : > { %v1817_v40 = vsub.f32 0.0, %v1779_v45  ;;  %v2344_v14 = vpop.f32.mrb[2].mxu0  ;;  %v2013_v45 = vld [vmem:[%s3848_s11 + $0x8] sm:$0xff] }
 0x4ae   : > { %v1827_v47 = vmul.f32 1.442695, %v1818_v1  ;;  %v1794_v22 = vadd.f32 %v2344_v14, %v1678_v58  ;;  %v1788_v19 = vpop.f32.mrb[3].mxu0  ;;  %v1924_v58 = vld [vmem:[%s3847_s10] sm:$0xff]  ;;  %v1857_v1 = vlaneseq }
 0x4af   : > { %v1825_v46 = vmul.f32 1.442695, %v1817_v40  ;;  %v1789_v41 = vadd.f32 %v1788_v19, %v1677_v57  ;;  %2367 = vmatprep.mubr.msk.f32.mxu1 %vm1587_vm2, %v1924_v58 }
 0x4b0   : > { %2565 = vpow2.f32 %v1827_v47  ;;  %v1820_v7 = vsub.f32 0.0, %v1794_v22  ;;  %v1858_v57 = vshrl.u32 %v1857_v1, 7  ;;  %v1867_v14 = vand.u32 127, %v1857_v1 }
 0x4b1   : > { %2567 = vpow2.f32 %v1825_v46  ;;  %v1819_v51 = vsub.f32 0.0, %v1789_v41  ;;  %v2347_v56 = vpop.f32.mrb[4].mxu0 }
 0x4b2   : > { %v1831_v43 = vmul.f32 1.442695, %v1820_v7  ;;  %v1804_v42 = vadd.f32 %v2347_v56, %v1680_v48  ;;  %v1798_v39 = vpop.f32.mrb[5].mxu0  ;;  %v1859_v40 = vadd.s32 8, %v1858_v57  ;;  %v1860_v47 = vadd.s32 16, %v1858_v57 }
 0x4b3   : > { %v1829_v52 = vmul.f32 1.442695, %v1819_v51  ;;  %v1799_v11 = vadd.f32 %v1798_v39, %v1679_v6  ;;  %vm1868_vm5 = vcmp.eq.s32.totalorder %v1858_v57, %v1867_v14  ;;  %v1861_v22 = vadd.s32 24, %v1858_v57 }
 0x4b4   : > { %2569 = vpow2.f32 %v1831_v43  ;;  %v1822_v3 = vsub.f32 0.0, %v1804_v42  ;;  %vm1869_vm6 = vcmp.eq.s32.totalorder %v1859_v40, %v1867_v14  ;;  %vm1870_vm8 = vcmp.eq.s32.totalorder %v1860_v47, %v1867_v14 }
 0x4b5   : > { %2571 = vpow2.f32 %v1829_v52  ;;  %v1821_v28 = vsub.f32 0.0, %v1799_v11  ;;  %v2350_v54 = vpop.f32.mrb[6].mxu0  ;;  %vm2395_vm7 = vmpackc.low %vm1869_vm6, %vm1868_vm5  ;;  %vm1871_vm9 = vcmp.eq.s32.totalorder %v1861_v22, %v1867_v14  ;;  %v1862_v7 = vadd.s32 32, %v1858_v57 }
 0x4b6   : > { %v1835_v21 = vmul.f32 1.442695, %v1822_v3  ;;  %v1814_v15 = vadd.f32 %v2350_v54, %v1682_v63  ;;  %v1808_v59 = vpop.f32.mrb[7].mxu0  ;;  %v1863_v6 = vadd.s32 40, %v1858_v57  ;;  %vm2401_vm10 = vmpackc.low %vm1871_vm9, %vm1870_vm8  ;;  %v1864_v63 = vadd.s32 48, %v1858_v57 }
 0x4b7   : > { %v1833_v34 = vmul.f32 1.442695, %v1821_v28  ;;  %v1809_v53 = vadd.f32 %v1808_v59, %v1681_v2  ;;  %vm1872_vm11 = vcmp.eq.s32.totalorder %v1862_v7, %v1867_v14  ;;  %v1865_v3 = vadd.s32 56, %v1858_v57  ;;  %v1925_v59 = vld [vmem:[%s3847_s10 + $0x8] sm:$0xff] }
 0x4b8   : > { %2573 = vpow2.f32 %v1835_v21  ;;  %v1824_v8 = vsub.f32 0.0, %v1814_v15  ;;  %vm1873_vm12 = vcmp.eq.s32.totalorder %v1863_v6, %v1867_v14  ;;  %vm1874_vm14 = vcmp.eq.s32.totalorder %v1864_v63, %v1867_v14 }
 0x4b9   : > { %2575 = vpow2.f32 %v1833_v34  ;;  %v1823_v5 = vsub.f32 0.0, %v1809_v53  ;;  %vm2407_vm13 = vmpackc.low %vm1873_vm12, %vm1872_vm11  ;;  %vm1875_vm15 = vcmp.eq.s32.totalorder %v1865_v3, %v1867_v14 }
 0x4ba   : > { %v2566_v31 = vpop.eup %2565  ;;  %v1839_v55 = vmul.f32 1.442695, %v1824_v8  ;;  %vm2413_vm0 = vmpackc.low %vm1875_vm15, %vm1874_vm14 }
 0x4bb   : > { %v2568_v29 = vpop.eup %2567  ;;  %v1842_v61 = vadd.f32 1.0, %v2566_v31  ;;  %v1837_v38 = vmul.f32 1.442695, %v1823_v5 }
 0x4bc   : > { %v1841_v20 = vadd.f32 1.0, %v2568_v29  ;;  %2577 = vpow2.f32 %v1839_v55 }
 0x4bd   : > { %2579 = vrcp.f32 %v1842_v61 }
 0x4be   : > { %v2570_v30 = vpop.eup %2569  ;;  %2581 = vrcp.f32 %v1841_v20  ;;  %v2597_v20 = vld [vmem:[%s2812_s19] sm:$0xff] }
 0x4bf   : > { %v2572_v32 = vpop.eup %2571  ;;  %v1844_v13 = vadd.f32 1.0, %v2570_v30  ;;  %2583 = vpow2.f32 %v1837_v38 }
 0x4c0   : > { %v1843_v24 = vadd.f32 1.0, %v2572_v32 }
 0x4c1   : > { %2585 = vrcp.f32 %v1844_v13 }
 0x4c2   : > { %v2574_v4 = vpop.eup %2573  ;;  %2587 = vrcp.f32 %v1843_v24  ;;  %v2598_v24 = vld [vmem:[%s2812_s19 + $0x8] sm:$0xff] }
 0x4c3   : > { %v2576_v60 = vpop.eup %2575  ;;  %v1846_v12 = vadd.f32 1.0, %v2574_v4 }
 0x4c4   : > { %v1845_v26 = vadd.f32 1.0, %v2576_v60 }
 0x4c5   : > { %2589 = vrcp.f32 %v1846_v12 }
 0x4c6   : > { %v2578_v16 = vpop.eup %2577  ;;  %2591 = vrcp.f32 %v1845_v26 }
 0x4c7   : > { %v2580_v25 = vpop.eup %2579  ;;  %v1848_v50 = vadd.f32 1.0, %v2578_v16 }
 0x4c8   : > { %v2582_v44 = vpop.eup %2581 }
 0x4c9   : > { %v2584_v18 = vpop.eup %2583  ;;  %v2473_v35 = vpack.i.bf16 %v2580_v25, %v2582_v44  ;;  %2593 = vrcp.f32 %v1848_v50 }
 0x4ca   : > { %v1847_v10 = vadd.f32 1.0, %v2584_v18 }
 0x4cb   : > { %v2586_v33 = vpop.eup %2585  ;;  %2474 = vperm.xlu1 %2472, %v2473_v35  }
 0x4cc   : > { %v2588_v9 = vpop.eup %2587  ;;  %2595 = vrcp.f32 %v1847_v10 }
 0x4cd   : > { %v2478_v0 = vpack.i.bf16 %v2586_v33, %v2588_v9 }
 0x4cf   : > { %v2590_v17 = vpop.eup %2589  ;;  %2479 = vperm.xlu0 %2471, %v2478_v0  }
 0x4d0   : > { %v2592_v36 = vpop.eup %2591 }
 0x4d1   : > { %v2483_v62 = vpack.i.bf16 %v2590_v17, %v2592_v36 }
 0x4d3   : > { %2016 = vperm.xlu0 %2471, %v2012_v23   ;;  %2484 = vperm.xlu1 %2472, %v2483_v62   ;;  %v2594_v49 = vpop.eup %2593 }
 0x4d6   : > { %v2596_v27 = vpop.eup %2595 }
 0x4d7   : > { %v2488_v37 = vpack.i.bf16 %v2594_v49, %v2596_v27 }
 0x4d9   : > { %2489 = vperm.xlu1 %2472, %v2488_v37  }
 0x4dd   : > { %2021 = vperm.xlu1 %2472, %v2013_v45  }
 0x54a   : > { %v2475_v19 = vpop.permute.xlu1 %2474 }
 0x54b   : > { %v2477_v46 = vunpack.i.h.bf16 %v2475_v19  ;;  %v2476_v41 = vunpack.i.l.bf16 %v2475_v19 }
 0x54d   : > { %v2394_v48 = vpack.c.bf16 %v2477_v46, %v2476_v41 }
 0x54e   : > { %v2480_v51 = vpop.permute.xlu0 %2479 }
 0x54f   : > { %v2482_v56 = vunpack.i.h.bf16 %v2480_v51  ;;  %v2481_v43 = vunpack.i.l.bf16 %v2480_v51  ;;  %2396 = vmatprep.subr.msk.bf16.mxu1 %vm2395_vm7, %v2394_v48 }
 0x550   : > { %2399 = vmatpush3.bf16.msk.msra.mxu1 %vm2395_vm7, %v2394_v48 }
 0x551   : > { %v2400_v42 = vpack.c.bf16 %v2482_v56, %v2481_v43 }
 0x552   : > { %v2485_v39 = vpop.permute.xlu1 %2484  ;;  %v2017_v5 = vpop.permute.xlu0 %2016 }
 0x553   : > { %v2487_v52 = vunpack.i.h.bf16 %v2485_v39  ;;  %v2486_v11 = vunpack.i.l.bf16 %v2485_v39  ;;  %2402 = vmatprep.subr.msk.bf16.mxu1 %vm2401_vm10, %v2400_v42 }
 0x554   : > { %2405 = vmatpush3.bf16.msk.msra.mxu1 %vm2401_vm10, %v2400_v42 }
 0x555   : > { %v2406_v2 = vpack.c.bf16 %v2487_v52, %v2486_v11 }
 0x557   : > { %2408 = vmatprep.subr.msk.bf16.mxu1 %vm2407_vm13, %v2406_v2 }
 0x558   : > { %v2490_v28 = vpop.permute.xlu1 %2489  ;;  %2411 = vmatpush3.bf16.msk.msra.mxu1 %vm2407_vm13, %v2406_v2 }
 0x559   : > { %v2492_v54 = vunpack.i.h.bf16 %v2490_v28  ;;  %v2491_v21 = vunpack.i.l.bf16 %v2490_v28 }
 0x55b   : > { %v2412_v15 = vpack.c.bf16 %v2492_v54, %v2491_v21 }
 0x55c   : > { %v2022_v61 = vpop.permute.xlu1 %2021 }
 0x55d   : > { %2414 = vmatprep.subr.msk.bf16.mxu1 %vm2413_vm0, %v2412_v15 }
 0x55e   : > { %2417 = vmatpush3.bf16.msk.msra.mxu1 %vm2413_vm0, %v2412_v15 }
 0x561   : > { %2368 = vmatmul.mubr.msk.f32.vlgmr.msra.gmra.mrb[10].mxu1 %vm1587_vm2, %v1925_v59 }
 0x634   : > { %v2369_v34 = vpop.f32.mrb[10].mxu1 }
 0x635   : > { %v1998_v53 = vpop.f32.mrb[11].mxu1 }
 0x636   : > { %v2007_v8 = vpack.c.bf16 %v2369_v34, %v1998_v53 }
 0x638   : > { %2379 = vmatmul.mubr.msk.bf16.vlgmr.msra.gmra.mrb[8].mxu0 %vm1587_vm2, %v2007_v8 }
 0x70b   : > { %v2061_v31 = vpop.f32.mrb[8].mxu0 }
 0x70c   : > { %v2062_v55 = vadd.f32 %v2061_v31, %v2017_v5  ;;  %v2380_v29 = vpop.f32.mrb[9].mxu0 }
 0x70d   : > { %v2064_v38 = vpop.f32.mrb[10].mxu0 }
 0x70e   : > { %v2068_v30 = vadd.f32 %v2597_v20, %v2062_v55  ;;  %v2065_v32 = vadd.f32 %v2064_v38, %v2022_v61  ;;  %v2381_v13 = vpop.f32.mrb[11].mxu0 }
 0x710   : > { %2070 = vst [vmem:[%s406_s17] sm:$0xff] %v2068_v30  ;;  %v2069_v4 = vadd.f32 %v2598_v24, %v2065_v32 }
 0x712   : > { %2071 = vst [vmem:[%s406_s17 + $0x8] sm:$0xff] %v2069_v4 }
 0x713   : > { %2612 = shalt.err (!%p2609_p3)
}
 0x714   : > { %s2613_s19 = scalar_lea.hbm %s3793_s26, 256  ;;  %s2617_s28 = scalar_lea.hbm %s3849_s12, 512 }
 0x715   : > { %p2614_p4 = scmp.ne.s32.totalorder %s3793_s26, %s2613_s19  ;;  %p2618_p9 = scmp.lt.u32.totalorder %s3793_s26, %s3849_s12 }
 0x716   : > { %p2619_p10 = scmp.lt.u32.totalorder %s2617_s28, %s2613_s19  ;;  %p2621_p12 = scmp.lt.u32.totalorder %s2613_s19, %s3793_s26 }
 0x717   : > { %p2615_p7 = pnand %p2614_p4, %p2781_p5 }
 0x718   : > { %p2620_p11 = por %p2619_p10, %p2618_p9 }
 0x719   : > { %p2616_p8 = pneg %p2615_p7 }
 0x71a   : > { %p2622_p13 = por %p2621_p12, %p2620_p11 }
 0x71c   : > { %p2623_p0 = pnand %p2622_p13, %p2616_p8 }
 0x71e   : > { %2626 = shalt.err (!%p2623_p0)
}
 0x71f   : > { %s2676_s30 = smov 128   ;;  %s2677_s16 = smov 8  }
 0x720   : > { %2418 = dma.vmem_to_hbm [thread:$0]  (%p2781_p5), %s3788_s20, 256, %s3793_s26, %s3796_s25, %s2676_s30, %s2676_s30, %s2677_s16  }
 0x721 PF: > { %p2424_p1 = scmp.ge.s32.totalorder %s2661_s24, 2  ;;  %s2101_s29 = sand.u32 1, %s2649_s21  }
 0x722   : > { %s2102_s19 = scalar_lea.sflag [#allocation3], %s2101_s29 }
 0x723   : > { %p2421_p2 = pnand %p2424_p1, %p2785_p6 }
 0x725   : > { %2644 = dma.done.wait (!%p2421_p2), %s2102_s19, 256  }
 0x726   : > { %2646 = vsyncadd (!%p2421_p2), %s2102_s19, 4294967040  ;;  %s3936_s0 = sld [smem:[#allocation5_spill]]  ;;  %p22_p3 = scmp.ge.s32.totalorder %s2768_s27, 4  }
 0x727   : > { %s3937_s21 = smov %s2653_s22  ;;  %s3938_s22 = smov %s2657_s23 }
 0x728   : > { %s3940_s24 = smov %s2768_s27  ;;  %24 = sbr.rel (!%p22_p3) target bundleno = 5 (0x5), region = 118 }
 0x72c   : > { %s3939_s23 = smov %s3936_s0 }
 0x72f   :  { %2107 = vsyncpa [#allocation3], 1 }
 0x730   :  { %2109 = vsyncpa [#allocation3 + $0x1], 1 }

</bundles_post_ra>
